<compile_context>
chip_gen: v7x
topology: tpu7x:2x2x1
jax: 0.10.0
libtpu: 0.0.40
codegen_flags: <defaults>
</compile_context>

<pallas_src>
import functools

import numpy as np
import jax
import jax.numpy as jnp
from jax import lax
from jax.experimental import pallas as pl
from jax.experimental.pallas import tpu as pltpu


# ----------------------------------------------------------------------------
# Fused flash-attention kernel.  One grid step = (batch b, query tile qi, kv tile ki).
# ----------------------------------------------------------------------------
def _flash_attention_kernel(x_ref, ctx_ref, wq_ref, wk_ref, wv_ref, wo_ref, bo_ref,
                            o_ref, q_scr, m_scr, l_scr, acc_scr,
                            *, heads, dim_head, scale, approx_recip):
    """Ref shapes (cdt = compute/MXU dtype, typically bf16):
      x_ref   : (1, tq, D)        query-side input tile
      ctx_ref : (1, tk, D)        key/value-side input tile
      wq_ref  : (D, inner)  cdt   constant across grid, single-buffered
      wk_ref  : (D, inner)  cdt
      wv_ref  : (D, inner)  cdt
      wo_ref  : (inner, D)  cdt
      bo_ref  : (1, D)            output bias (kept in caller dtype, added in f32)
      o_ref   : (1, tq, D)        written only on the last KV step
      q_scr   : (H, tq, dh) cdt   pre-scaled query, computed once per (b, qi)
      m_scr   : (H, tq, 1)  f32   running softmax max
      l_scr   : (H, tq, 1)  f32   running softmax denominator
      acc_scr : (H, tq, dh) f32   running numerator
    """
    ki = pl.program_id(2)
    cdt = wq_ref.dtype
    tq = x_ref.shape[1]

    @pl.when(ki == 0)
    def _init():
        # One lane-dense (tq, D) x (D, inner) projection for q, once per query tile.
        # Fold the softmax scale into q here (cheaper than scaling the scores).
        q = jnp.dot(x_ref[0], wq_ref[...], preferred_element_type=jnp.float32) * scale
        q = q.astype(cdt)                                     # (tq, inner)
        for h in range(heads):                                # static lane slices
            q_scr[h] = q[:, h * dim_head:(h + 1) * dim_head]
        m_scr[...] = jnp.full_like(m_scr, -jnp.inf)
        l_scr[...] = jnp.zeros_like(l_scr)
        acc_scr[...] = jnp.zeros_like(acc_scr)

    # Lane-dense K/V projections for this KV tile: single (tk, D) x (D, inner) matmuls.
    c = ctx_ref[0]                                            # (tk, D)
    k = jnp.dot(c, wk_ref[...], preferred_element_type=jnp.float32).astype(cdt)
    v = jnp.dot(c, wv_ref[...], preferred_element_type=jnp.float32).astype(cdt)

    # Online-softmax update, per head (contraction dim is dh — inherently per-head;
    # the MXU work is identical to a head-batched dot, but these stay 2-D).
    for h in range(heads):
        k_h = k[:, h * dim_head:(h + 1) * dim_head]           # (tk, dh)
        v_h = v[:, h * dim_head:(h + 1) * dim_head]           # (tk, dh)
        # q_h @ k_h^T, f32 accumulation.  (NT matmul; K^T pre-layout is a TODO.)
        s = lax.dot_general(q_scr[h], k_h, (((1,), (1,)), ((), ())),
                            preferred_element_type=jnp.float32)   # (tq, tk)
        m_prev = m_scr[h]                                      # (tq, 1)
        m_new = jnp.maximum(m_prev, jnp.max(s, axis=-1, keepdims=True))
        alpha = jnp.exp(m_prev - m_new)
        p = jnp.exp(s - m_new)                                 # (tq, tk) f32
        l_scr[h] = alpha * l_scr[h] + jnp.sum(p, axis=-1, keepdims=True)
        acc_scr[h] = alpha * acc_scr[h] + jnp.dot(
            p.astype(cdt), v_h, preferred_element_type=jnp.float32)
        m_scr[h] = m_new

    @pl.when(ki == pl.num_programs(2) - 1)
    def _finalize():
        # Normalize, merge heads (lane concat), and fuse the head merge into ONE
        # (tq, inner) x (inner, D) output matmul — no (H, N, D) intermediate.
        parts = []
        for h in range(heads):
            inv_l = pl.reciprocal(l_scr[h], approx=approx_recip)   # EUP slot
            parts.append((acc_scr[h] * inv_l).astype(cdt))         # (tq, dh)
        merged = jnp.concatenate(parts, axis=-1)                   # (tq, inner)
        out = jnp.dot(merged, wo_ref[...], preferred_element_type=jnp.float32)
        out = out + bo_ref[...].astype(jnp.float32)                # (tq, D)
        o_ref[0] = out.astype(o_ref.dtype)


# ----------------------------------------------------------------------------
# Wrapper: host-side weight split / dtype cast, tile selection, pallas_call.
# ----------------------------------------------------------------------------
def _pick_tile(n, cap):
    """Largest multiple-of-8 divisor of n that is <= cap, else n (no tiling)."""
    if n <= cap:
        return n
    t = cap - (cap % 8)
    while t >= 8:
        if n % t == 0:
            return t
        t -= 8
    return n


def pallas_attention(x, wq, wkv, wo, bo, *, heads, dim_head,
                     context=None, kv_include_self=False,
                     compute_dtype=jnp.bfloat16,
                     q_tile=256, kv_tile=512,
                     vmem_limit_bytes=48 * 1024 * 1024):
    B, N, D = x.shape
    inner = heads * dim_head
    scale = float(dim_head) ** -0.5
    out_dtype = x.dtype
    cdt = np.dtype(compute_dtype) if compute_dtype is not None else np.dtype(x.dtype)

    ctx = x if context is None else context
    if kv_include_self:
        ctx = jnp.concatenate([x, ctx], axis=1)
    M = ctx.shape[1]

    # One-time host-side prep: split the fused KV weight, cast MXU operands once.
    wk = wkv[:, :inner]
    wv = wkv[:, inner:]
    x_c, ctx_c = x.astype(cdt), ctx.astype(cdt)
    wq_c, wk_c, wv_c, wo_c = (w.astype(cdt) for w in (wq, wk, wv, wo))
    bo2 = bo.reshape(1, D)

    tq = _pick_tile(N, q_tile)
    tk = _pick_tile(M, kv_tile)
    grid = (B, N // tq, M // tk)

    def _const_spec(shape):
        # Weights/bias are identical for every grid step: single-buffer them so they
        # don't eat 2x VMEM (v7x has only 64 MiB; v5e's scoped default is 16 MiB).
        return pl.BlockSpec(shape, lambda b, qi, ki: (0,) * len(shape),
                            pipeline_mode=pl.Buffered(1))

    kernel = functools.partial(
        _flash_attention_kernel, heads=heads, dim_head=dim_head, scale=scale,
        approx_recip=bool(cdt != np.dtype(np.float32)))

    grid_spec = pltpu.PrefetchScalarGridSpec(
        num_scalar_prefetch=0,
        grid=grid,
        in_specs=[
            pl.BlockSpec((1, tq, D), lambda b, qi, ki: (b, qi, 0)),   # x
            pl.BlockSpec((1, tk, D), lambda b, qi, ki: (b, ki, 0)),   # ctx
            _const_spec((D, inner)),                                  # wq
            _const_spec((D, inner)),                                  # wk
            _const_spec((D, inner)),                                  # wv
            _const_spec((inner, D)),                                  # wo
            _const_spec((1, D)),                                      # bo
        ],
        out_specs=pl.BlockSpec((1, tq, D), lambda b, qi, ki: (b, qi, 0)),
        scratch_shapes=[
            pltpu.VMEM((heads, tq, dim_head), cdt),          # q (pre-scaled)
            pltpu.VMEM((heads, tq, 1), jnp.float32),         # running max
            pltpu.VMEM((heads, tq, 1), jnp.float32),         # running denom
            pltpu.VMEM((heads, tq, dim_head), jnp.float32),  # running numerator
        ],
    )

    return pl.pallas_call(
        kernel,
        out_shape=jax.ShapeDtypeStruct((B, N, D), out_dtype),
        grid_spec=grid_spec,
        compiler_params=pltpu.CompilerParams(
            dimension_semantics=("parallel", "parallel", "arbitrary"),
            vmem_limit_bytes=vmem_limit_bytes,
        ),
    )(x_c, ctx_c, wq_c, wk_c, wv_c, wo_c, bo2)
    # TODO(synk): nn.Dropout(p=0.0) / inference is an identity — intentionally omitted.


# ----------------------------------------------------------------------------
# Pure-JAX reference (mirrors the PyTorch module exactly) for validation.
# ----------------------------------------------------------------------------
def attention_reference(x, wq, wkv, wo, bo, *, heads, dim_head,
                        context=None, kv_include_self=False):
    B, N, D = x.shape
    inner = heads * dim_head
    scale = float(dim_head) ** -0.5
    ctx = x if context is None else context
    if kv_include_self:
        ctx = jnp.concatenate([x, ctx], axis=1)

    q = x @ wq                                   # (B, N, inner)
    kv = ctx @ wkv                               # (B, M, 2*inner)
    k, v = kv[..., :inner], kv[..., inner:]

    def split(t):
        b, n, _ = t.shape
        return t.reshape(b, n, heads, dim_head).transpose(0, 2, 1, 3)

    qh, kh, vh = split(q), split(k), split(v)    # (B, H, *, dh)
    s = jnp.einsum('bhid,bhjd->bhij', qh, kh) * scale
    p = jax.nn.softmax(s, axis=-1)
    o = jnp.einsum('bhij,bhjd->bhid', p, vh)
    o = o.transpose(0, 2, 1, 3).reshape(B, N, inner)
    return o @ wo + bo


if __name__ == "__main__":
    # Small shapes consistent with the module: (batch, seq, dim), heads * dim_head = inner.
    B, N, dim = 2, 8, 32
    heads, dim_head = 4, 8
    inner = heads * dim_head

    key = jax.random.PRNGKey(0)
    kx, kc, kq, kkv, ko, kb = jax.random.split(key, 6)
    x = jax.random.normal(kx, (B, N, dim), jnp.float32)
    wq = 0.05 * jax.random.normal(kq, (dim, inner), jnp.float32)
    wkv = 0.05 * jax.random.normal(kkv, (dim, 2 * inner), jnp.float32)
    wo = 0.05 * jax.random.normal(ko, (inner, dim), jnp.float32)
    bo = 0.05 * jax.random.normal(kb, (dim,), jnp.float32)

    # --- self-attention, bf16 compute path ---------------------------------
    run = jax.jit(functools.partial(pallas_attention, heads=heads, dim_head=dim_head))
    out = jax.block_until_ready(run(x, wq, wkv, wo, bo))
    ref = attention_reference(x, wq, wkv, wo, bo, heads=heads, dim_head=dim_head)
    assert out.shape == (B, N, dim)
    assert bool(jnp.all(jnp.isfinite(out)))
    err1 = float(jnp.max(jnp.abs(out - ref)))
    assert bool(jnp.allclose(out, ref, rtol=2e-2, atol=5e-3)), f"self max abs err = {err1}"

    # --- cross-attention with kv_include_self, f32 compute path ------------
    ctx = jax.random.normal(kc, (B, 6, dim), jnp.float32)
    run_x = jax.jit(functools.partial(pallas_attention, heads=heads, dim_head=dim_head,
                                      kv_include_self=True,
                                      compute_dtype=jnp.float32))
    out2 = jax.block_until_ready(run_x(x, wq, wkv, wo, bo, context=ctx))
    ref2 = attention_reference(x, wq, wkv, wo, bo, heads=heads, dim_head=dim_head,
                               context=ctx, kv_include_self=True)
    assert out2.shape == (B, N, dim)
    assert bool(jnp.all(jnp.isfinite(out2)))
    err2 = float(jnp.max(jnp.abs(out2 - ref2)))
    assert bool(jnp.allclose(out2, ref2, rtol=2e-2, atol=5e-3)), f"cross max abs err = {err2}"

    print("KERNEL_OK")
</pallas_src>

<mosaic_0001>
module attributes {stable_mosaic.version = 11 : i64} {
  func.func @_flash_attention_kernel(%arg0: i32, %arg1: i32, %arg2: i32, %arg3: memref<1x8x32xbf16, #tpu.memory_space<vmem>>, %arg4: memref<1x8x32xbf16, #tpu.memory_space<vmem>>, %arg5: memref<32x32xbf16, #tpu.memory_space<vmem>>, %arg6: memref<32x32xbf16, #tpu.memory_space<vmem>>, %arg7: memref<32x32xbf16, #tpu.memory_space<vmem>>, %arg8: memref<32x32xbf16, #tpu.memory_space<vmem>>, %arg9: memref<1x32xf32, #tpu.memory_space<vmem>>, %arg10: memref<1x8x32xf32, #tpu.memory_space<vmem>>, %arg11: memref<4x8x8xbf16, #tpu.memory_space<vmem>>, %arg12: memref<4x8x1xf32, #tpu.memory_space<vmem>>, %arg13: memref<4x8x1xf32, #tpu.memory_space<vmem>>, %arg14: memref<4x8x8xf32, #tpu.memory_space<vmem>>) attributes {dimension_semantics = [#tpu.dimension_semantics<parallel>, #tpu.dimension_semantics<parallel>, #tpu.dimension_semantics<arbitrary>], iteration_bounds = array<i64: 2, 1, 1>, scalar_prefetch = 0 : i64, scratch_operands = 4 : i64, tpu.core_type = #tpu.core_type<tc>, window_params = [{transform_indices = @transform_0, window_bounds = array<i64: 1, 8, 32>}, {transform_indices = @transform_1, window_bounds = array<i64: 1, 8, 32>}, {pipeline_mode = #tpu.pipeline_mode<synchronous>, transform_indices = @transform_2, window_bounds = array<i64: 32, 32>}, {pipeline_mode = #tpu.pipeline_mode<synchronous>, transform_indices = @transform_3, window_bounds = array<i64: 32, 32>}, {pipeline_mode = #tpu.pipeline_mode<synchronous>, transform_indices = @transform_4, window_bounds = array<i64: 32, 32>}, {pipeline_mode = #tpu.pipeline_mode<synchronous>, transform_indices = @transform_5, window_bounds = array<i64: 32, 32>}, {pipeline_mode = #tpu.pipeline_mode<synchronous>, transform_indices = @transform_6, window_bounds = array<i64: 1, 32>}, {transform_indices = @transform_7, window_bounds = array<i64: 1, 8, 32>}]} {
    %c0_i32 = arith.constant 0 : i32
    %0 = arith.cmpi eq, %arg2, %c0_i32 : i32
    %1 = arith.extui %0 : i1 to i32
    %c0_i32_0 = arith.constant 0 : i32
    %2 = arith.cmpi ne, %1, %c0_i32_0 : i32
    scf.if %2 {
      %c0_107 = arith.constant 0 : index
      %c0_108 = arith.constant 0 : index
      %c0_109 = arith.constant 0 : index
      %162 = vector.load %arg3[%c0_107, %c0_108, %c0_109] : memref<1x8x32xbf16, #tpu.memory_space<vmem>>, vector<1x8x32xbf16>
      %163 = vector.shape_cast %162 : vector<1x8x32xbf16> to vector<8x32xbf16>
      %c0_110 = arith.constant 0 : index
      %c0_111 = arith.constant 0 : index
      %164 = vector.load %arg5[%c0_110, %c0_111] : memref<32x32xbf16, #tpu.memory_space<vmem>>, vector<32x32xbf16>
      %cst_112 = arith.constant dense<0.000000e+00> : vector<8x32xf32>
      %165 = tpu.matmul %163, %164, %cst_112 {dimension_numbers = #tpu.dot_dimension_numbers<[1], [0], [0], [1], [0, 0, 1, 1], [], []>} : vector<8x32xbf16>, vector<32x32xbf16>, vector<8x32xf32> -> vector<8x32xf32>
      %cst_113 = arith.constant 0.353553385 : f32
      %166 = vector.broadcast %cst_113 : f32 to vector<8x32xf32>
      %167 = arith.mulf %165, %166 : vector<8x32xf32>
      %168 = arith.truncf %167 : vector<8x32xf32> to vector<8x32xbf16>
      %169 = vector.extract_strided_slice %168 {offsets = [0, 0], sizes = [8, 8], strides = [1, 1]} : vector<8x32xbf16> to vector<8x8xbf16>
      %c0_114 = arith.constant 0 : index
      %c0_115 = arith.constant 0 : index
      %c0_116 = arith.constant 0 : index
      %170 = vector.load %arg11[%c0_114, %c0_115, %c0_116] : memref<4x8x8xbf16, #tpu.memory_space<vmem>>, vector<1x8x8xbf16>
      %171 = vector.shape_cast %170 : vector<1x8x8xbf16> to vector<8x8xbf16>
      %172 = vector.shape_cast %169 : vector<8x8xbf16> to vector<1x8x8xbf16>
      tpu.vector_store %arg11[%c0_114, %c0_115, %c0_116], %172 {strides = array<i32>} : memref<4x8x8xbf16, #tpu.memory_space<vmem>>, vector<1x8x8xbf16>,
      %173 = vector.extract_strided_slice %168 {offsets = [0, 8], sizes = [8, 8], strides = [1, 1]} : vector<8x32xbf16> to vector<8x8xbf16>
      %c1_117 = arith.constant 1 : index
      %c0_118 = arith.constant 0 : index
      %c0_119 = arith.constant 0 : index
      %174 = vector.load %arg11[%c1_117, %c0_118, %c0_119] : memref<4x8x8xbf16, #tpu.memory_space<vmem>>, vector<1x8x8xbf16>
      %175 = vector.shape_cast %174 : vector<1x8x8xbf16> to vector<8x8xbf16>
      %176 = vector.shape_cast %173 : vector<8x8xbf16> to vector<1x8x8xbf16>
      tpu.vector_store %arg11[%c1_117, %c0_118, %c0_119], %176 {strides = array<i32>} : memref<4x8x8xbf16, #tpu.memory_space<vmem>>, vector<1x8x8xbf16>,
      %177 = vector.extract_strided_slice %168 {offsets = [0, 16], sizes = [8, 8], strides = [1, 1]} : vector<8x32xbf16> to vector<8x8xbf16>
      %c2_120 = arith.constant 2 : index
      %c0_121 = arith.constant 0 : index
      %c0_122 = arith.constant 0 : index
      %178 = vector.load %arg11[%c2_120, %c0_121, %c0_122] : memref<4x8x8xbf16, #tpu.memory_space<vmem>>, vector<1x8x8xbf16>
      %179 = vector.shape_cast %178 : vector<1x8x8xbf16> to vector<8x8xbf16>
      %180 = vector.shape_cast %177 : vector<8x8xbf16> to vector<1x8x8xbf16>
      tpu.vector_store %arg11[%c2_120, %c0_121, %c0_122], %180 {strides = array<i32>} : memref<4x8x8xbf16, #tpu.memory_space<vmem>>, vector<1x8x8xbf16>,
      %181 = vector.extract_strided_slice %168 {offsets = [0, 24], sizes = [8, 8], strides = [1, 1]} : vector<8x32xbf16> to vector<8x8xbf16>
      %c3_123 = arith.constant 3 : index
      %c0_124 = arith.constant 0 : index
      %c0_125 = arith.constant 0 : index
      %182 = vector.load %arg11[%c3_123, %c0_124, %c0_125] : memref<4x8x8xbf16, #tpu.memory_space<vmem>>, vector<1x8x8xbf16>
      %183 = vector.shape_cast %182 : vector<1x8x8xbf16> to vector<8x8xbf16>
      %184 = vector.shape_cast %181 : vector<8x8xbf16> to vector<1x8x8xbf16>
      tpu.vector_store %arg11[%c3_123, %c0_124, %c0_125], %184 {strides = array<i32>} : memref<4x8x8xbf16, #tpu.memory_space<vmem>>, vector<1x8x8xbf16>,
      %cst_126 = arith.constant 0xFF800000 : f32
      %185 = vector.broadcast %cst_126 : f32 to vector<4x8x1xf32>
      %c0_127 = arith.constant 0 : index
      %c0_128 = arith.constant 0 : index
      %c0_129 = arith.constant 0 : index
      %186 = vector.load %arg12[%c0_127, %c0_128, %c0_129] : memref<4x8x1xf32, #tpu.memory_space<vmem>>, vector<4x8x1xf32>
      tpu.vector_store %arg12[%c0_127, %c0_128, %c0_129], %185 {strides = array<i32>} : memref<4x8x1xf32, #tpu.memory_space<vmem>>, vector<4x8x1xf32>,
      %cst_130 = arith.constant 0.000000e+00 : f32
      %187 = vector.broadcast %cst_130 : f32 to vector<4x8x1xf32>
      %c0_131 = arith.constant 0 : index
      %c0_132 = arith.constant 0 : index
      %c0_133 = arith.constant 0 : index
      %188 = vector.load %arg13[%c0_131, %c0_132, %c0_133] : memref<4x8x1xf32, #tpu.memory_space<vmem>>, vector<4x8x1xf32>
      tpu.vector_store %arg13[%c0_131, %c0_132, %c0_133], %187 {strides = array<i32>} : memref<4x8x1xf32, #tpu.memory_space<vmem>>, vector<4x8x1xf32>,
      %cst_134 = arith.constant 0.000000e+00 : f32
      %189 = vector.broadcast %cst_134 : f32 to vector<4x8x8xf32>
      %c0_135 = arith.constant 0 : index
      %c0_136 = arith.constant 0 : index
      %c0_137 = arith.constant 0 : index
      %190 = vector.load %arg14[%c0_135, %c0_136, %c0_137] : memref<4x8x8xf32, #tpu.memory_space<vmem>>, vector<4x8x8xf32>
      tpu.vector_store %arg14[%c0_135, %c0_136, %c0_137], %189 {strides = array<i32>} : memref<4x8x8xf32, #tpu.memory_space<vmem>>, vector<4x8x8xf32>,
    } else {
    }
    %c0 = arith.constant 0 : index
    %c0_1 = arith.constant 0 : index
    %c0_2 = arith.constant 0 : index
    %3 = vector.load %arg4[%c0, %c0_1, %c0_2] : memref<1x8x32xbf16, #tpu.memory_space<vmem>>, vector<1x8x32xbf16>
    %4 = vector.shape_cast %3 : vector<1x8x32xbf16> to vector<8x32xbf16>
    %c0_3 = arith.constant 0 : index
    %c0_4 = arith.constant 0 : index
    %5 = vector.load %arg6[%c0_3, %c0_4] : memref<32x32xbf16, #tpu.memory_space<vmem>>, vector<32x32xbf16>
    %cst = arith.constant dense<0.000000e+00> : vector<8x32xf32>
    %6 = tpu.matmul %4, %5, %cst {dimension_numbers = #tpu.dot_dimension_numbers<[1], [0], [0], [1], [0, 0, 1, 1], [], []>} : vector<8x32xbf16>, vector<32x32xbf16>, vector<8x32xf32> -> vector<8x32xf32>
    %7 = arith.truncf %6 : vector<8x32xf32> to vector<8x32xbf16>
    %c0_5 = arith.constant 0 : index
    %c0_6 = arith.constant 0 : index
    %8 = vector.load %arg7[%c0_5, %c0_6] : memref<32x32xbf16, #tpu.memory_space<vmem>>, vector<32x32xbf16>
    %cst_7 = arith.constant dense<0.000000e+00> : vector<8x32xf32>
    %9 = tpu.matmul %4, %8, %cst_7 {dimension_numbers = #tpu.dot_dimension_numbers<[1], [0], [0], [1], [0, 0, 1, 1], [], []>} : vector<8x32xbf16>, vector<32x32xbf16>, vector<8x32xf32> -> vector<8x32xf32>
    %10 = arith.truncf %9 : vector<8x32xf32> to vector<8x32xbf16>
    %11 = vector.extract_strided_slice %7 {offsets = [0, 0], sizes = [8, 8], strides = [1, 1]} : vector<8x32xbf16> to vector<8x8xbf16>
    %12 = vector.extract_strided_slice %10 {offsets = [0, 0], sizes = [8, 8], strides = [1, 1]} : vector<8x32xbf16> to vector<8x8xbf16>
    %c0_8 = arith.constant 0 : index
    %c0_9 = arith.constant 0 : index
    %c0_10 = arith.constant 0 : index
    %13 = vector.load %arg11[%c0_8, %c0_9, %c0_10] : memref<4x8x8xbf16, #tpu.memory_space<vmem>>, vector<1x8x8xbf16>
    %14 = vector.shape_cast %13 : vector<1x8x8xbf16> to vector<8x8xbf16>
    %cst_11 = arith.constant dense<0.000000e+00> : vector<8x8xf32>
    %15 = tpu.matmul %14, %11, %cst_11 {dimension_numbers = #tpu.dot_dimension_numbers<[1], [1], [0], [0], [0, 0, 1, 0], [], []>} : vector<8x8xbf16>, vector<8x8xbf16>, vector<8x8xf32> -> vector<8x8xf32>
    %c0_12 = arith.constant 0 : index
    %c0_13 = arith.constant 0 : index
    %c0_14 = arith.constant 0 : index
    %16 = vector.load %arg12[%c0_12, %c0_13, %c0_14] : memref<4x8x1xf32, #tpu.memory_space<vmem>>, vector<1x8x1xf32>
    %17 = vector.shape_cast %16 : vector<1x8x1xf32> to vector<8x1xf32>
    %cst_15 = arith.constant dense<0xFF800000> : vector<8xf32>
    %18 = vector.multi_reduction <maximumf>, %15, %cst_15 [1] : vector<8x8xf32> to vector<8xf32>
    %19 = vector.shape_cast %18 : vector<8xf32> to vector<8x1xf32>
    %20 = arith.maximumf %17, %19 : vector<8x1xf32>
    %21 = arith.subf %17, %20 : vector<8x1xf32>
    %22 = math.exp %21 : vector<8x1xf32>
    %23 = vector.broadcast %20 : vector<8x1xf32> to vector<8x8xf32>
    %24 = arith.subf %15, %23 : vector<8x8xf32>
    %25 = math.exp %24 : vector<8x8xf32>
    %c0_16 = arith.constant 0 : index
    %c0_17 = arith.constant 0 : index
    %c0_18 = arith.constant 0 : index
    %26 = vector.load %arg13[%c0_16, %c0_17, %c0_18] : memref<4x8x1xf32, #tpu.memory_space<vmem>>, vector<1x8x1xf32>
    %27 = vector.shape_cast %26 : vector<1x8x1xf32> to vector<8x1xf32>
    %28 = arith.mulf %22, %27 : vector<8x1xf32>
    %cst_19 = arith.constant dense<0.000000e+00> : vector<8xf32>
    %29 = vector.multi_reduction <add>, %25, %cst_19 [1] : vector<8x8xf32> to vector<8xf32>
    %30 = vector.shape_cast %29 : vector<8xf32> to vector<8x1xf32>
    %31 = arith.addf %28, %30 : vector<8x1xf32>
    %c0_20 = arith.constant 0 : index
    %c0_21 = arith.constant 0 : index
    %c0_22 = arith.constant 0 : index
    %32 = vector.load %arg13[%c0_20, %c0_21, %c0_22] : memref<4x8x1xf32, #tpu.memory_space<vmem>>, vector<1x8x1xf32>
    %33 = vector.shape_cast %32 : vector<1x8x1xf32> to vector<8x1xf32>
    %34 = vector.shape_cast %31 : vector<8x1xf32> to vector<1x8x1xf32>
    tpu.vector_store %arg13[%c0_20, %c0_21, %c0_22], %34 {strides = array<i32>} : memref<4x8x1xf32, #tpu.memory_space<vmem>>, vector<1x8x1xf32>,
    %c0_23 = arith.constant 0 : index
    %c0_24 = arith.constant 0 : index
    %c0_25 = arith.constant 0 : index
    %35 = vector.load %arg14[%c0_23, %c0_24, %c0_25] : memref<4x8x8xf32, #tpu.memory_space<vmem>>, vector<1x8x8xf32>
    %36 = vector.shape_cast %35 : vector<1x8x8xf32> to vector<8x8xf32>
    %37 = vector.broadcast %22 : vector<8x1xf32> to vector<8x8xf32>
    %38 = arith.mulf %37, %36 : vector<8x8xf32>
    %39 = arith.truncf %25 : vector<8x8xf32> to vector<8x8xbf16>
    %cst_26 = arith.constant dense<0.000000e+00> : vector<8x8xf32>
    %40 = tpu.matmul %39, %12, %cst_26 {dimension_numbers = #tpu.dot_dimension_numbers<[1], [0], [0], [1], [0, 0, 1, 1], [], []>} : vector<8x8xbf16>, vector<8x8xbf16>, vector<8x8xf32> -> vector<8x8xf32>
    %41 = arith.addf %38, %40 : vector<8x8xf32>
    %c0_27 = arith.constant 0 : index
    %c0_28 = arith.constant 0 : index
    %c0_29 = arith.constant 0 : index
    %42 = vector.load %arg14[%c0_27, %c0_28, %c0_29] : memref<4x8x8xf32, #tpu.memory_space<vmem>>, vector<1x8x8xf32>
    %43 = vector.shape_cast %42 : vector<1x8x8xf32> to vector<8x8xf32>
    %44 = vector.shape_cast %41 : vector<8x8xf32> to vector<1x8x8xf32>
    tpu.vector_store %arg14[%c0_27, %c0_28, %c0_29], %44 {strides = array<i32>} : memref<4x8x8xf32, #tpu.memory_space<vmem>>, vector<1x8x8xf32>,
    %c0_30 = arith.constant 0 : index
    %c0_31 = arith.constant 0 : index
    %c0_32 = arith.constant 0 : index
    %45 = vector.load %arg12[%c0_30, %c0_31, %c0_32] : memref<4x8x1xf32, #tpu.memory_space<vmem>>, vector<1x8x1xf32>
    %46 = vector.shape_cast %45 : vector<1x8x1xf32> to vector<8x1xf32>
    %47 = vector.shape_cast %20 : vector<8x1xf32> to vector<1x8x1xf32>
    tpu.vector_store %arg12[%c0_30, %c0_31, %c0_32], %47 {strides = array<i32>} : memref<4x8x1xf32, #tpu.memory_space<vmem>>, vector<1x8x1xf32>,
    %48 = vector.extract_strided_slice %7 {offsets = [0, 8], sizes = [8, 8], strides = [1, 1]} : vector<8x32xbf16> to vector<8x8xbf16>
    %49 = vector.extract_strided_slice %10 {offsets = [0, 8], sizes = [8, 8], strides = [1, 1]} : vector<8x32xbf16> to vector<8x8xbf16>
    %c1 = arith.constant 1 : index
    %c0_33 = arith.constant 0 : index
    %c0_34 = arith.constant 0 : index
    %50 = vector.load %arg11[%c1, %c0_33, %c0_34] : memref<4x8x8xbf16, #tpu.memory_space<vmem>>, vector<1x8x8xbf16>
    %51 = vector.shape_cast %50 : vector<1x8x8xbf16> to vector<8x8xbf16>
    %cst_35 = arith.constant dense<0.000000e+00> : vector<8x8xf32>
    %52 = tpu.matmul %51, %48, %cst_35 {dimension_numbers = #tpu.dot_dimension_numbers<[1], [1], [0], [0], [0, 0, 1, 0], [], []>} : vector<8x8xbf16>, vector<8x8xbf16>, vector<8x8xf32> -> vector<8x8xf32>
    %c1_36 = arith.constant 1 : index
    %c0_37 = arith.constant 0 : index
    %c0_38 = arith.constant 0 : index
    %53 = vector.load %arg12[%c1_36, %c0_37, %c0_38] : memref<4x8x1xf32, #tpu.memory_space<vmem>>, vector<1x8x1xf32>
    %54 = vector.shape_cast %53 : vector<1x8x1xf32> to vector<8x1xf32>
    %cst_39 = arith.constant dense<0xFF800000> : vector<8xf32>
    %55 = vector.multi_reduction <maximumf>, %52, %cst_39 [1] : vector<8x8xf32> to vector<8xf32>
    %56 = vector.shape_cast %55 : vector<8xf32> to vector<8x1xf32>
    %57 = arith.maximumf %54, %56 : vector<8x1xf32>
    %58 = arith.subf %54, %57 : vector<8x1xf32>
    %59 = math.exp %58 : vector<8x1xf32>
    %60 = vector.broadcast %57 : vector<8x1xf32> to vector<8x8xf32>
    %61 = arith.subf %52, %60 : vector<8x8xf32>
    %62 = math.exp %61 : vector<8x8xf32>
    %c1_40 = arith.constant 1 : index
    %c0_41 = arith.constant 0 : index
    %c0_42 = arith.constant 0 : index
    %63 = vector.load %arg13[%c1_40, %c0_41, %c0_42] : memref<4x8x1xf32, #tpu.memory_space<vmem>>, vector<1x8x1xf32>
    %64 = vector.shape_cast %63 : vector<1x8x1xf32> to vector<8x1xf32>
    %65 = arith.mulf %59, %64 : vector<8x1xf32>
    %cst_43 = arith.constant dense<0.000000e+00> : vector<8xf32>
    %66 = vector.multi_reduction <add>, %62, %cst_43 [1] : vector<8x8xf32> to vector<8xf32>
    %67 = vector.shape_cast %66 : vector<8xf32> to vector<8x1xf32>
    %68 = arith.addf %65, %67 : vector<8x1xf32>
    %c1_44 = arith.constant 1 : index
    %c0_45 = arith.constant 0 : index
    %c0_46 = arith.constant 0 : index
    %69 = vector.load %arg13[%c1_44, %c0_45, %c0_46] : memref<4x8x1xf32, #tpu.memory_space<vmem>>, vector<1x8x1xf32>
    %70 = vector.shape_cast %69 : vector<1x8x1xf32> to vector<8x1xf32>
    %71 = vector.shape_cast %68 : vector<8x1xf32> to vector<1x8x1xf32>
    tpu.vector_store %arg13[%c1_44, %c0_45, %c0_46], %71 {strides = array<i32>} : memref<4x8x1xf32, #tpu.memory_space<vmem>>, vector<1x8x1xf32>,
    %c1_47 = arith.constant 1 : index
    %c0_48 = arith.constant 0 : index
    %c0_49 = arith.constant 0 : index
    %72 = vector.load %arg14[%c1_47, %c0_48, %c0_49] : memref<4x8x8xf32, #tpu.memory_space<vmem>>, vector<1x8x8xf32>
    %73 = vector.shape_cast %72 : vector<1x8x8xf32> to vector<8x8xf32>
    %74 = vector.broadcast %59 : vector<8x1xf32> to vector<8x8xf32>
    %75 = arith.mulf %74, %73 : vector<8x8xf32>
    %76 = arith.truncf %62 : vector<8x8xf32> to vector<8x8xbf16>
    %cst_50 = arith.constant dense<0.000000e+00> : vector<8x8xf32>
    %77 = tpu.matmul %76, %49, %cst_50 {dimension_numbers = #tpu.dot_dimension_numbers<[1], [0], [0], [1], [0, 0, 1, 1], [], []>} : vector<8x8xbf16>, vector<8x8xbf16>, vector<8x8xf32> -> vector<8x8xf32>
    %78 = arith.addf %75, %77 : vector<8x8xf32>
    %c1_51 = arith.constant 1 : index
    %c0_52 = arith.constant 0 : index
    %c0_53 = arith.constant 0 : index
    %79 = vector.load %arg14[%c1_51, %c0_52, %c0_53] : memref<4x8x8xf32, #tpu.memory_space<vmem>>, vector<1x8x8xf32>
    %80 = vector.shape_cast %79 : vector<1x8x8xf32> to vector<8x8xf32>
    %81 = vector.shape_cast %78 : vector<8x8xf32> to vector<1x8x8xf32>
    tpu.vector_store %arg14[%c1_51, %c0_52, %c0_53], %81 {strides = array<i32>} : memref<4x8x8xf32, #tpu.memory_space<vmem>>, vector<1x8x8xf32>,
    %c1_54 = arith.constant 1 : index
    %c0_55 = arith.constant 0 : index
    %c0_56 = arith.constant 0 : index
    %82 = vector.load %arg12[%c1_54, %c0_55, %c0_56] : memref<4x8x1xf32, #tpu.memory_space<vmem>>, vector<1x8x1xf32>
    %83 = vector.shape_cast %82 : vector<1x8x1xf32> to vector<8x1xf32>
    %84 = vector.shape_cast %57 : vector<8x1xf32> to vector<1x8x1xf32>
    tpu.vector_store %arg12[%c1_54, %c0_55, %c0_56], %84 {strides = array<i32>} : memref<4x8x1xf32, #tpu.memory_space<vmem>>, vector<1x8x1xf32>,
    %85 = vector.extract_strided_slice %7 {offsets = [0, 16], sizes = [8, 8], strides = [1, 1]} : vector<8x32xbf16> to vector<8x8xbf16>
    %86 = vector.extract_strided_slice %10 {offsets = [0, 16], sizes = [8, 8], strides = [1, 1]} : vector<8x32xbf16> to vector<8x8xbf16>
    %c2 = arith.constant 2 : index
    %c0_57 = arith.constant 0 : index
    %c0_58 = arith.constant 0 : index
    %87 = vector.load %arg11[%c2, %c0_57, %c0_58] : memref<4x8x8xbf16, #tpu.memory_space<vmem>>, vector<1x8x8xbf16>
    %88 = vector.shape_cast %87 : vector<1x8x8xbf16> to vector<8x8xbf16>
    %cst_59 = arith.constant dense<0.000000e+00> : vector<8x8xf32>
    %89 = tpu.matmul %88, %85, %cst_59 {dimension_numbers = #tpu.dot_dimension_numbers<[1], [1], [0], [0], [0, 0, 1, 0], [], []>} : vector<8x8xbf16>, vector<8x8xbf16>, vector<8x8xf32> -> vector<8x8xf32>
    %c2_60 = arith.constant 2 : index
    %c0_61 = arith.constant 0 : index
    %c0_62 = arith.constant 0 : index
    %90 = vector.load %arg12[%c2_60, %c0_61, %c0_62] : memref<4x8x1xf32, #tpu.memory_space<vmem>>, vector<1x8x1xf32>
    %91 = vector.shape_cast %90 : vector<1x8x1xf32> to vector<8x1xf32>
    %cst_63 = arith.constant dense<0xFF800000> : vector<8xf32>
    %92 = vector.multi_reduction <maximumf>, %89, %cst_63 [1] : vector<8x8xf32> to vector<8xf32>
    %93 = vector.shape_cast %92 : vector<8xf32> to vector<8x1xf32>
    %94 = arith.maximumf %91, %93 : vector<8x1xf32>
    %95 = arith.subf %91, %94 : vector<8x1xf32>
    %96 = math.exp %95 : vector<8x1xf32>
    %97 = vector.broadcast %94 : vector<8x1xf32> to vector<8x8xf32>
    %98 = arith.subf %89, %97 : vector<8x8xf32>
    %99 = math.exp %98 : vector<8x8xf32>
    %c2_64 = arith.constant 2 : index
    %c0_65 = arith.constant 0 : index
    %c0_66 = arith.constant 0 : index
    %100 = vector.load %arg13[%c2_64, %c0_65, %c0_66] : memref<4x8x1xf32, #tpu.memory_space<vmem>>, vector<1x8x1xf32>
    %101 = vector.shape_cast %100 : vector<1x8x1xf32> to vector<8x1xf32>
    %102 = arith.mulf %96, %101 : vector<8x1xf32>
    %cst_67 = arith.constant dense<0.000000e+00> : vector<8xf32>
    %103 = vector.multi_reduction <add>, %99, %cst_67 [1] : vector<8x8xf32> to vector<8xf32>
    %104 = vector.shape_cast %103 : vector<8xf32> to vector<8x1xf32>
    %105 = arith.addf %102, %104 : vector<8x1xf32>
    %c2_68 = arith.constant 2 : index
    %c0_69 = arith.constant 0 : index
    %c0_70 = arith.constant 0 : index
    %106 = vector.load %arg13[%c2_68, %c0_69, %c0_70] : memref<4x8x1xf32, #tpu.memory_space<vmem>>, vector<1x8x1xf32>
    %107 = vector.shape_cast %106 : vector<1x8x1xf32> to vector<8x1xf32>
    %108 = vector.shape_cast %105 : vector<8x1xf32> to vector<1x8x1xf32>
    tpu.vector_store %arg13[%c2_68, %c0_69, %c0_70], %108 {strides = array<i32>} : memref<4x8x1xf32, #tpu.memory_space<vmem>>, vector<1x8x1xf32>,
    %c2_71 = arith.constant 2 : index
    %c0_72 = arith.constant 0 : index
    %c0_73 = arith.constant 0 : index
    %109 = vector.load %arg14[%c2_71, %c0_72, %c0_73] : memref<4x8x8xf32, #tpu.memory_space<vmem>>, vector<1x8x8xf32>
    %110 = vector.shape_cast %109 : vector<1x8x8xf32> to vector<8x8xf32>
    %111 = vector.broadcast %96 : vector<8x1xf32> to vector<8x8xf32>
    %112 = arith.mulf %111, %110 : vector<8x8xf32>
    %113 = arith.truncf %99 : vector<8x8xf32> to vector<8x8xbf16>
    %cst_74 = arith.constant dense<0.000000e+00> : vector<8x8xf32>
    %114 = tpu.matmul %113, %86, %cst_74 {dimension_numbers = #tpu.dot_dimension_numbers<[1], [0], [0], [1], [0, 0, 1, 1], [], []>} : vector<8x8xbf16>, vector<8x8xbf16>, vector<8x8xf32> -> vector<8x8xf32>
    %115 = arith.addf %112, %114 : vector<8x8xf32>
    %c2_75 = arith.constant 2 : index
    %c0_76 = arith.constant 0 : index
    %c0_77 = arith.constant 0 : index
    %116 = vector.load %arg14[%c2_75, %c0_76, %c0_77] : memref<4x8x8xf32, #tpu.memory_space<vmem>>, vector<1x8x8xf32>
    %117 = vector.shape_cast %116 : vector<1x8x8xf32> to vector<8x8xf32>
    %118 = vector.shape_cast %115 : vector<8x8xf32> to vector<1x8x8xf32>
    tpu.vector_store %arg14[%c2_75, %c0_76, %c0_77], %118 {strides = array<i32>} : memref<4x8x8xf32, #tpu.memory_space<vmem>>, vector<1x8x8xf32>,
    %c2_78 = arith.constant 2 : index
    %c0_79 = arith.constant 0 : index
    %c0_80 = arith.constant 0 : index
    %119 = vector.load %arg12[%c2_78, %c0_79, %c0_80] : memref<4x8x1xf32, #tpu.memory_space<vmem>>, vector<1x8x1xf32>
    %120 = vector.shape_cast %119 : vector<1x8x1xf32> to vector<8x1xf32>
    %121 = vector.shape_cast %94 : vector<8x1xf32> to vector<1x8x1xf32>
    tpu.vector_store %arg12[%c2_78, %c0_79, %c0_80], %121 {strides = array<i32>} : memref<4x8x1xf32, #tpu.memory_space<vmem>>, vector<1x8x1xf32>,
    %122 = vector.extract_strided_slice %7 {offsets = [0, 24], sizes = [8, 8], strides = [1, 1]} : vector<8x32xbf16> to vector<8x8xbf16>
    %123 = vector.extract_strided_slice %10 {offsets = [0, 24], sizes = [8, 8], strides = [1, 1]} : vector<8x32xbf16> to vector<8x8xbf16>
    %c3 = arith.constant 3 : index
    %c0_81 = arith.constant 0 : index
    %c0_82 = arith.constant 0 : index
    %124 = vector.load %arg11[%c3, %c0_81, %c0_82] : memref<4x8x8xbf16, #tpu.memory_space<vmem>>, vector<1x8x8xbf16>
    %125 = vector.shape_cast %124 : vector<1x8x8xbf16> to vector<8x8xbf16>
    %cst_83 = arith.constant dense<0.000000e+00> : vector<8x8xf32>
    %126 = tpu.matmul %125, %122, %cst_83 {dimension_numbers = #tpu.dot_dimension_numbers<[1], [1], [0], [0], [0, 0, 1, 0], [], []>} : vector<8x8xbf16>, vector<8x8xbf16>, vector<8x8xf32> -> vector<8x8xf32>
    %c3_84 = arith.constant 3 : index
    %c0_85 = arith.constant 0 : index
    %c0_86 = arith.constant 0 : index
    %127 = vector.load %arg12[%c3_84, %c0_85, %c0_86] : memref<4x8x1xf32, #tpu.memory_space<vmem>>, vector<1x8x1xf32>
    %128 = vector.shape_cast %127 : vector<1x8x1xf32> to vector<8x1xf32>
    %cst_87 = arith.constant dense<0xFF800000> : vector<8xf32>
    %129 = vector.multi_reduction <maximumf>, %126, %cst_87 [1] : vector<8x8xf32> to vector<8xf32>
    %130 = vector.shape_cast %129 : vector<8xf32> to vector<8x1xf32>
    %131 = arith.maximumf %128, %130 : vector<8x1xf32>
    %132 = arith.subf %128, %131 : vector<8x1xf32>
    %133 = math.exp %132 : vector<8x1xf32>
    %134 = vector.broadcast %131 : vector<8x1xf32> to vector<8x8xf32>
    %135 = arith.subf %126, %134 : vector<8x8xf32>
    %136 = math.exp %135 : vector<8x8xf32>
    %c3_88 = arith.constant 3 : index
    %c0_89 = arith.constant 0 : index
    %c0_90 = arith.constant 0 : index
    %137 = vector.load %arg13[%c3_88, %c0_89, %c0_90] : memref<4x8x1xf32, #tpu.memory_space<vmem>>, vector<1x8x1xf32>
    %138 = vector.shape_cast %137 : vector<1x8x1xf32> to vector<8x1xf32>
    %139 = arith.mulf %133, %138 : vector<8x1xf32>
    %cst_91 = arith.constant dense<0.000000e+00> : vector<8xf32>
    %140 = vector.multi_reduction <add>, %136, %cst_91 [1] : vector<8x8xf32> to vector<8xf32>
    %141 = vector.shape_cast %140 : vector<8xf32> to vector<8x1xf32>
    %142 = arith.addf %139, %141 : vector<8x1xf32>
    %c3_92 = arith.constant 3 : index
    %c0_93 = arith.constant 0 : index
    %c0_94 = arith.constant 0 : index
    %143 = vector.load %arg13[%c3_92, %c0_93, %c0_94] : memref<4x8x1xf32, #tpu.memory_space<vmem>>, vector<1x8x1xf32>
    %144 = vector.shape_cast %143 : vector<1x8x1xf32> to vector<8x1xf32>
    %145 = vector.shape_cast %142 : vector<8x1xf32> to vector<1x8x1xf32>
    tpu.vector_store %arg13[%c3_92, %c0_93, %c0_94], %145 {strides = array<i32>} : memref<4x8x1xf32, #tpu.memory_space<vmem>>, vector<1x8x1xf32>,
    %c3_95 = arith.constant 3 : index
    %c0_96 = arith.constant 0 : index
    %c0_97 = arith.constant 0 : index
    %146 = vector.load %arg14[%c3_95, %c0_96, %c0_97] : memref<4x8x8xf32, #tpu.memory_space<vmem>>, vector<1x8x8xf32>
    %147 = vector.shape_cast %146 : vector<1x8x8xf32> to vector<8x8xf32>
    %148 = vector.broadcast %133 : vector<8x1xf32> to vector<8x8xf32>
    %149 = arith.mulf %148, %147 : vector<8x8xf32>
    %150 = arith.truncf %136 : vector<8x8xf32> to vector<8x8xbf16>
    %cst_98 = arith.constant dense<0.000000e+00> : vector<8x8xf32>
    %151 = tpu.matmul %150, %123, %cst_98 {dimension_numbers = #tpu.dot_dimension_numbers<[1], [0], [0], [1], [0, 0, 1, 1], [], []>} : vector<8x8xbf16>, vector<8x8xbf16>, vector<8x8xf32> -> vector<8x8xf32>
    %152 = arith.addf %149, %151 : vector<8x8xf32>
    %c3_99 = arith.constant 3 : index
    %c0_100 = arith.constant 0 : index
    %c0_101 = arith.constant 0 : index
    %153 = vector.load %arg14[%c3_99, %c0_100, %c0_101] : memref<4x8x8xf32, #tpu.memory_space<vmem>>, vector<1x8x8xf32>
    %154 = vector.shape_cast %153 : vector<1x8x8xf32> to vector<8x8xf32>
    %155 = vector.shape_cast %152 : vector<8x8xf32> to vector<1x8x8xf32>
    tpu.vector_store %arg14[%c3_99, %c0_100, %c0_101], %155 {strides = array<i32>} : memref<4x8x8xf32, #tpu.memory_space<vmem>>, vector<1x8x8xf32>,
    %c3_102 = arith.constant 3 : index
    %c0_103 = arith.constant 0 : index
    %c0_104 = arith.constant 0 : index
    %156 = vector.load %arg12[%c3_102, %c0_103, %c0_104] : memref<4x8x1xf32, #tpu.memory_space<vmem>>, vector<1x8x1xf32>
    %157 = vector.shape_cast %156 : vector<1x8x1xf32> to vector<8x1xf32>
    %158 = vector.shape_cast %131 : vector<8x1xf32> to vector<1x8x1xf32>
    tpu.vector_store %arg12[%c3_102, %c0_103, %c0_104], %158 {strides = array<i32>} : memref<4x8x1xf32, #tpu.memory_space<vmem>>, vector<1x8x1xf32>,
    %c0_i32_105 = arith.constant 0 : i32
    %159 = arith.cmpi eq, %arg2, %c0_i32_105 : i32
    %160 = arith.extui %159 : i1 to i32
    %c0_i32_106 = arith.constant 0 : i32
    %161 = arith.cmpi ne, %160, %c0_i32_106 : i32
    scf.if %161 {
      %c0_107 = arith.constant 0 : index
      %c0_108 = arith.constant 0 : index
      %c0_109 = arith.constant 0 : index
      %162 = vector.load %arg13[%c0_107, %c0_108, %c0_109] : memref<4x8x1xf32, #tpu.memory_space<vmem>>, vector<1x8x1xf32>
      %163 = vector.shape_cast %162 : vector<1x8x1xf32> to vector<8x1xf32>
      %164 = tpu.reciprocal %163 {approx = true} : vector<8x1xf32> -> vector<8x1xf32>
      %c0_110 = arith.constant 0 : index
      %c0_111 = arith.constant 0 : index
      %c0_112 = arith.constant 0 : index
      %165 = vector.load %arg14[%c0_110, %c0_111, %c0_112] : memref<4x8x8xf32, #tpu.memory_space<vmem>>, vector<1x8x8xf32>
      %166 = vector.shape_cast %165 : vector<1x8x8xf32> to vector<8x8xf32>
      %167 = vector.broadcast %164 : vector<8x1xf32> to vector<8x8xf32>
      %168 = arith.mulf %166, %167 : vector<8x8xf32>
      %169 = arith.truncf %168 : vector<8x8xf32> to vector<8x8xbf16>
      %c1_113 = arith.constant 1 : index
      %c0_114 = arith.constant 0 : index
      %c0_115 = arith.constant 0 : index
      %170 = vector.load %arg13[%c1_113, %c0_114, %c0_115] : memref<4x8x1xf32, #tpu.memory_space<vmem>>, vector<1x8x1xf32>
      %171 = vector.shape_cast %170 : vector<1x8x1xf32> to vector<8x1xf32>
      %172 = tpu.reciprocal %171 {approx = true} : vector<8x1xf32> -> vector<8x1xf32>
      %c1_116 = arith.constant 1 : index
      %c0_117 = arith.constant 0 : index
      %c0_118 = arith.constant 0 : index
      %173 = vector.load %arg14[%c1_116, %c0_117, %c0_118] : memref<4x8x8xf32, #tpu.memory_space<vmem>>, vector<1x8x8xf32>
      %174 = vector.shape_cast %173 : vector<1x8x8xf32> to vector<8x8xf32>
      %175 = vector.broadcast %172 : vector<8x1xf32> to vector<8x8xf32>
      %176 = arith.mulf %174, %175 : vector<8x8xf32>
      %177 = arith.truncf %176 : vector<8x8xf32> to vector<8x8xbf16>
      %c2_119 = arith.constant 2 : index
      %c0_120 = arith.constant 0 : index
      %c0_121 = arith.constant 0 : index
      %178 = vector.load %arg13[%c2_119, %c0_120, %c0_121] : memref<4x8x1xf32, #tpu.memory_space<vmem>>, vector<1x8x1xf32>
      %179 = vector.shape_cast %178 : vector<1x8x1xf32> to vector<8x1xf32>
      %180 = tpu.reciprocal %179 {approx = true} : vector<8x1xf32> -> vector<8x1xf32>
      %c2_122 = arith.constant 2 : index
      %c0_123 = arith.constant 0 : index
      %c0_124 = arith.constant 0 : index
      %181 = vector.load %arg14[%c2_122, %c0_123, %c0_124] : memref<4x8x8xf32, #tpu.memory_space<vmem>>, vector<1x8x8xf32>
      %182 = vector.shape_cast %181 : vector<1x8x8xf32> to vector<8x8xf32>
      %183 = vector.broadcast %180 : vector<8x1xf32> to vector<8x8xf32>
      %184 = arith.mulf %182, %183 : vector<8x8xf32>
      %185 = arith.truncf %184 : vector<8x8xf32> to vector<8x8xbf16>
      %c3_125 = arith.constant 3 : index
      %c0_126 = arith.constant 0 : index
      %c0_127 = arith.constant 0 : index
      %186 = vector.load %arg13[%c3_125, %c0_126, %c0_127] : memref<4x8x1xf32, #tpu.memory_space<vmem>>, vector<1x8x1xf32>
      %187 = vector.shape_cast %186 : vector<1x8x1xf32> to vector<8x1xf32>
      %188 = tpu.reciprocal %187 {approx = true} : vector<8x1xf32> -> vector<8x1xf32>
      %c3_128 = arith.constant 3 : index
      %c0_129 = arith.constant 0 : index
      %c0_130 = arith.constant 0 : index
      %189 = vector.load %arg14[%c3_128, %c0_129, %c0_130] : memref<4x8x8xf32, #tpu.memory_space<vmem>>, vector<1x8x8xf32>
      %190 = vector.shape_cast %189 : vector<1x8x8xf32> to vector<8x8xf32>
      %191 = vector.broadcast %188 : vector<8x1xf32> to vector<8x8xf32>
      %192 = arith.mulf %190, %191 : vector<8x8xf32>
      %193 = arith.truncf %192 : vector<8x8xf32> to vector<8x8xbf16>
      %194 = tpu.concatenate %169, %177, %185, %193 in 1 : vector<8x8xbf16>, vector<8x8xbf16>, vector<8x8xbf16>, vector<8x8xbf16> -> vector<8x32xbf16>
      %c0_131 = arith.constant 0 : index
      %c0_132 = arith.constant 0 : index
      %195 = vector.load %arg8[%c0_131, %c0_132] : memref<32x32xbf16, #tpu.memory_space<vmem>>, vector<32x32xbf16>
      %cst_133 = arith.constant dense<0.000000e+00> : vector<8x32xf32>
      %196 = tpu.matmul %194, %195, %cst_133 {dimension_numbers = #tpu.dot_dimension_numbers<[1], [0], [0], [1], [0, 0, 1, 1], [], []>} : vector<8x32xbf16>, vector<32x32xbf16>, vector<8x32xf32> -> vector<8x32xf32>
      %c0_134 = arith.constant 0 : index
      %c0_135 = arith.constant 0 : index
      %197 = vector.load %arg9[%c0_134, %c0_135] : memref<1x32xf32, #tpu.memory_space<vmem>>, vector<1x32xf32>
      %198 = vector.broadcast %197 : vector<1x32xf32> to vector<8x32xf32>
      %199 = arith.addf %196, %198 : vector<8x32xf32>
      %c0_136 = arith.constant 0 : index
      %c0_137 = arith.constant 0 : index
      %c0_138 = arith.constant 0 : index
      %200 = vector.load %arg10[%c0_136, %c0_137, %c0_138] : memref<1x8x32xf32, #tpu.memory_space<vmem>>, vector<1x8x32xf32>
      %201 = vector.shape_cast %200 : vector<1x8x32xf32> to vector<8x32xf32>
      %202 = vector.shape_cast %199 : vector<8x32xf32> to vector<1x8x32xf32>
      tpu.vector_store %arg10[%c0_136, %c0_137, %c0_138], %202 {strides = array<i32>} : memref<1x8x32xf32, #tpu.memory_space<vmem>>, vector<1x8x32xf32>,
    } else {
    }
    return
  }
  func.func @transform_0(%arg0: i32, %arg1: i32, %arg2: i32) -> (i32, i32, i32) {
    %c0_i32 = arith.constant 0 : i32
    %c0_i32_0 = arith.constant 0 : i32
    return %arg0, %arg1, %c0_i32 : i32, i32, i32
  }
  func.func @transform_1(%arg0: i32, %arg1: i32, %arg2: i32) -> (i32, i32, i32) {
    %c0_i32 = arith.constant 0 : i32
    %c0_i32_0 = arith.constant 0 : i32
    return %arg0, %arg2, %c0_i32 : i32, i32, i32
  }
  func.func @transform_2(%arg0: i32, %arg1: i32, %arg2: i32) -> (i32, i32) {
    %c0_i32 = arith.constant 0 : i32
    %c0_i32_0 = arith.constant 0 : i32
    %c0_i32_1 = arith.constant 0 : i32
    return %c0_i32, %c0_i32_0 : i32, i32
  }
  func.func @transform_3(%arg0: i32, %arg1: i32, %arg2: i32) -> (i32, i32) {
    %c0_i32 = arith.constant 0 : i32
    %c0_i32_0 = arith.constant 0 : i32
    %c0_i32_1 = arith.constant 0 : i32
    return %c0_i32, %c0_i32_0 : i32, i32
  }
  func.func @transform_4(%arg0: i32, %arg1: i32, %arg2: i32) -> (i32, i32) {
    %c0_i32 = arith.constant 0 : i32
    %c0_i32_0 = arith.constant 0 : i32
    %c0_i32_1 = arith.constant 0 : i32
    return %c0_i32, %c0_i32_0 : i32, i32
  }
  func.func @transform_5(%arg0: i32, %arg1: i32, %arg2: i32) -> (i32, i32) {
    %c0_i32 = arith.constant 0 : i32
    %c0_i32_0 = arith.constant 0 : i32
    %c0_i32_1 = arith.constant 0 : i32
    return %c0_i32, %c0_i32_0 : i32, i32
  }
  func.func @transform_6(%arg0: i32, %arg1: i32, %arg2: i32) -> (i32, i32) {
    %c0_i32 = arith.constant 0 : i32
    %c0_i32_0 = arith.constant 0 : i32
    %c0_i32_1 = arith.constant 0 : i32
    return %c0_i32, %c0_i32_0 : i32, i32
  }
  func.func @transform_7(%arg0: i32, %arg1: i32, %arg2: i32) -> (i32, i32, i32) {
    %c0_i32 = arith.constant 0 : i32
    %c0_i32_0 = arith.constant 0 : i32
    return %arg0, %arg1, %c0_i32 : i32, i32, i32
  }
}

</mosaic_0001>

<bundles_post_ra>
// kernel: pallas_attention.1
= control target key start
LH: loop header
LB: loop body
LE: loop exit
PB: predicated region body
PF: predicated region fallthrough
CT: control target
= control target key end

     0   :  { %12 = vsyncpa [#allocation7], 0  ;;  %s1989_s0 = inlined_call_operand.vmem [shape: bf16[2,8,32], index: 0, kind: input, shape index: {}, may-alias: {0,1}]   ;;  %s1990_s1 = inlined_call_operand.vmem [shape: bf16[2,8,32], index: 1, kind: input, shape index: {}, may-alias: {0,1}]   ;;  %s1991_s2 = inlined_call_operand.vmem [shape: bf16[32,32], index: 2, kind: input, shape index: {}]   ;;  %s1992_s3 = inlined_call_operand.vmem [shape: bf16[32,32], index: 3, kind: input, shape index: {}]   ;;  %s1993_s4 = inlined_call_operand.vmem [shape: bf16[32,32], index: 4, kind: input, shape index: {}]   ;;  %s1994_s5 = inlined_call_operand.vmem [shape: bf16[32,32], index: 5, kind: input, shape index: {}]   ;;  %s1995_s6 = inlined_call_operand.vmem [shape: f32[1,32], index: 6, kind: input, shape index: {}]   ;;  %s1996_s7 = inlined_call_operand.hbm [shape: f32[2,8,32], index: 7, kind: output, shape index: {}]  }
   0x1   :  { %14 = vsyncpa [#allocation7 + $0x1], 0  ;;  %s1696_s24 = smov 0   ;;  %s1698_s25 = smov 0  }
   0x2   :  { %s1700_s26 = smov 0   ;;  %s1702_s27 = smov 0  }
   0x3   :  { %s1704_s28 = smov 0   ;;  %s1706_s29 = smov 0  }
   0x4 LB: > { %s1323_s30 = sadd.s32 4294967295, %s1643_s29   ;;  %s1324_s8 = sadd.s32 4294967294, %s1643_s29   ;;  %s1643_s29 = sphi %s1706_s29, %s20_s29   ;;  %s1639_s28 = sphi %s1704_s28, %s2003_s28   ;;  %s1635_s27 = sphi %s1702_s27, %s2002_s27   ;;  %s1631_s26 = sphi %s1700_s26, %s2001_s26   ;;  %s1627_s25 = sphi %s1698_s25, %s2000_s25   ;;  %s1623_s24 = sphi %s1696_s24, %s1999_s24  }
   0x5   : > { %s39_s9 = sadd.s32 1, %s1639_s28  ;;  %s209_s10 = sadd.s32 1, %s1631_s26 }
   0x6   : > { %p41_p0 = scmp.ge.s32.totalorder %s39_s9, 2  ;;  %p219_p1 = scmp.ne.s32.totalorder %s1631_s26, %s1627_s25 }
   0x7   : > { %p220_p2 = scmp.eq.s32.totalorder %s1323_s30, 1  ;;  %p225_p3 = scmp.ne.s32.totalorder %s1627_s25, %s1623_s24 }
   0x8   : > { %s2005_s9 = smov (%p41_p0, %s39_s9), 0  ;;  %p226_p5 = scmp.eq.s32.totalorder %s1324_s8, 1 }
   0x9   : > { %p1736_p4 = por %p220_p2, %p219_p1  ;;  %s204_s12 = ssub.s32 %s1639_s28, %s2005_s9 }
   0xa   : > { %p1327_p6 = scmp.ge.s32.totalorder %s1643_s29, 1  ;;  %p207_p7 = scmp.eq.s32.totalorder %s204_s12, 0 }
   0xb   : > { %p1743_p8 = por %p226_p5, %p225_p3  ;;  %p279_p9 = scmp.lt.s32.totalorder %s1643_s29, 3 }
   0xc   : > { %s1749_s14 = scalar_select %p207_p7, %s1631_s26, %s209_s10  }
   0xd   : > { %p280_p10 = pnand %p1327_p6, %p279_p9 }
   0xe   : > { %v1533_v0 = vld [vmem:[%s1991_s2] sm:$0xff] (!%p280_p10)   ;;  %v1645_v1 = vmov (!%p280_p10), 0.0   ;;  %v1535_v3 = vld [vmem:[%s1991_s2 + $0x8] sm:$0xff] (!%p280_p10)   ;;  %vm1646_vm0 = vmmov (!%p280_p10), 0   ;;  %p320_p11 = scmp.lt.s32.totalorder (!%p280_p10), %s1635_s27, 1  ;;  %vm356_vm1 = vcmask (!%p280_p10), 261120  }
   0xf   : > { %283 = sbr.rel (%p280_p10) target bundleno = 1526 (0x5f6), region = 48  ;;  %1386 = vmatprep.subr.bf16.mxu0 (!%p280_p10), %v1645_v1  ;;  %1394 = vmatprep.subr.bf16.mxu1 (!%p280_p10), %v1645_v1  ;;  %v1534_v2 = vld [vmem:[%s1992_s3] sm:$0xff] (!%p280_p10)   ;;  %v1536_v4 = vld [vmem:[%s1992_s3 + $0x8] sm:$0xff] (!%p280_p10)   ;;  %vm431_vm2 = vcmask (!%p280_p10), 64512   ;;  %vm402_vm3 = vcmask (!%p280_p10), 60416   ;;  %s1647_s18 = smov (!%p280_p10), 112  }
  0x10   : > { %1387 = vmatpush3.bf16.msra.mxu0 (!%p280_p10), %v1533_v0  ;;  %1390 = vmatprep.mubr.msk.bf16.mxu0 (!%p280_p10), %vm1646_vm0, %v1645_v1  ;;  %432 = vst.msk [vmem:[#allocation5] sm:$0xff] (!%p280_p10), %vm431_vm2, %v1645_v1  ;;  %433 = vst.msk [vmem:[#allocation5 + $0x8] sm:$0xff] (!%p280_p10), %vm431_vm2, %v1645_v1  ;;  %s1648_s19 = smov (!%p280_p10), 120   ;;  %s1649_s20 = smov (!%p280_p10), 104   ;;  %v1537_v20 = vld [vmem:[%s1993_s4] sm:$0xff] (!%p280_p10)   ;;  %v1538_v21 = vld [vmem:[%s1993_s4 + $0x8] sm:$0xff] (!%p280_p10)  }
  0x11   : > { %1395 = vmatpush3.bf16.msra.mxu1 (!%p280_p10), %v1534_v2  ;;  %1388 = vmatprep.subr.bf16.mxu0 (!%p280_p10), %v1645_v1  ;;  %434 = vst.msk [vmem:[#allocation5 + $0x10] sm:$0xff] (!%p280_p10), %vm431_vm2, %v1645_v1  ;;  %435 = vst.msk [vmem:[#allocation5 + $0x18] sm:$0xff] (!%p280_p10), %vm431_vm2, %v1645_v1  ;;  %vm422_vm4 = vcmask (!%p280_p10), 7168   ;;  %v1650_v39 = vmov (!%p280_p10), -inf   ;;  %v1651_v40 = vmov (!%p280_p10), 0   ;;  %vm638_vm5 = vcmask (!%p280_p10), 1043456  }
  0x12   : > { %1396 = vmatprep.subr.bf16.mxu1 (!%p280_p10), %v1645_v1  ;;  %1398 = vmatprep.mubr.msk.bf16.mxu1 (!%p280_p10), %vm1646_vm0, %v1645_v1  ;;  %423 = vst.msk [vmem:[#allocation3] sm:$0xff] (!%p280_p10), %vm422_vm4, %v1650_v39  ;;  %424 = vst.msk [vmem:[#allocation3 + $0x8] sm:$0xff] (!%p280_p10), %vm422_vm4, %v1650_v39  ;;  %s1652_s16 = smov (!%p280_p10), 8   ;;  %vm1147_vm6 = vcmask (!%p280_p10), 130048   ;;  %vm1150_vm7 = vcmask (!%p280_p10), 195584  }
  0x13   : > { %425 = vst.msk [vmem:[#allocation3 + $0x10] sm:$0xff] (!%p280_p10), %vm422_vm4, %v1650_v39  ;;  %426 = vst.msk [vmem:[#allocation3 + $0x18] sm:$0xff] (!%p280_p10), %vm422_vm4, %v1650_v39  ;;  %1531 = vset.pattern.permute.xlu1 (!%p280_p10), %v1651_v40  ;;  %1532 = vset.pattern.permute.xlu0 (!%p280_p10), %v1651_v40 }
  0x14   : > { %1389 = vmatpush3.bf16.msra.mxu0 (!%p280_p10), %v1535_v3  ;;  %427 = vst.msk [vmem:[#allocation4] sm:$0xff] (!%p280_p10), %vm422_vm4, %v1645_v1  ;;  %428 = vst.msk [vmem:[#allocation4 + $0x8] sm:$0xff] (!%p280_p10), %vm422_vm4, %v1645_v1 }
  0x15   : > { %1397 = vmatpush3.bf16.msra.mxu1 (!%p280_p10), %v1536_v4  ;;  %1402 = vmatprep.subr.bf16.mxu0 (!%p280_p10), %v1645_v1  ;;  %429 = vst.msk [vmem:[#allocation4 + $0x10] sm:$0xff] (!%p280_p10), %vm422_vm4, %v1645_v1  ;;  %430 = vst.msk [vmem:[#allocation4 + $0x18] sm:$0xff] (!%p280_p10), %vm422_vm4, %v1645_v1 }
  0x16   : > { %s321_s23 = scalar_select %p320_p11, %s1635_s27, 1  ;;  %1410 = vmatprep.subr.bf16.mxu1 %v1645_v1 }
  0x18   : > { %s1329_s30 = sshll.u32 %s321_s23, 2  ;;  %s1354_s23 = sshll.u32 %s1635_s27, 7 }
  0x19   : > { %s326_s12 = scalar_lea.vmem %s1989_s0, %s1329_s30  ;;  %s333_s17 = scalar_lea.vmem %s1990_s1, %s1329_s30  ;;  %v1861_v56 = vld [vmem:[#allocation3] sm:$0xff]  ;;  %v737_v3 = vld [vmem:[#allocation3 + $0x8] sm:$0xff] }
  0x1a   : > { %v339_v5 = vld [vmem:[%s326_s12] sm:$0xf]  ;;  %s1941_s15 = scalar_lea.hbm %s1996_s7, %s1354_s23 }
  0x1b   : > { %v436_v6 = vld [vmem:[%s333_s17] sm:$0xf]  ;;  %1391 = vmatmul.mubr.msk.bf16.vlgmr.msra.gmra.mrb[0].mxu0 %vm356_vm1, %v339_v5  ;;  %s1653_s17 = smov 16  }
  0x1c   : > { %1399 = vmatmul.mubr.msk.bf16.vlgmr.msra.gmra.mrb[0].mxu1 %vm356_vm1, %v436_v6  ;;  %1406 = vmatprep.mubr.msk.bf16.mxu0 %vm1646_vm0, %v1645_v1 }
  0x1d   : > { %1412 = vmatprep.mubr.msk.bf16.mxu1 %vm1646_vm0, %v1645_v1  ;;  %1403 = vmatpush3.bf16.msra.mxu0 %v1537_v20 }
  0x1e   : > { %1404 = vmatprep.subr.bf16.mxu0 %v1645_v1 }
  0x21   : > { %1405 = vmatpush3.bf16.msra.mxu0 %v1538_v21 }
  0x22   : > { %1416 = vmatprep.subr.bf16.mxu0 %v1645_v1 }
  0x24   : > { %1407 = vmatmul.mubr.msk.bf16.vlgmr.msra.gmra.mrb[4].mxu0 %vm356_vm1, %v436_v6 }
  0x25   : > { %1418 = vmatprep.mubr.msk.bf16.mxu0 %vm1646_vm0, %v1645_v1 }
  0xee   : > { %v394_v7 = vpop.f32.mrb[0].mxu0 }
  0xef   : > { %v400_v8 = vmul.f32 0.35355338, %v394_v7  ;;  %v1392_v9 = vpop.f32.mrb[1].mxu0  ;;  %v491_v10 = vpop.f32.mrb[0].mxu1  ;;  %v1874_v7 = vld [vmem:[#allocation3 + $0x10] sm:$0xff] }
  0xf0   : > { %v397_v11 = vpop.f32.mrb[2].mxu0  ;;  %v497_v12 = vpack.c.bf16 %v491_v10, %v491_v10  ;;  %v1400_v13 = vpop.f32.mrb[1].mxu1 }
  0xf1   : > { %v401_v14 = vpack.c.bf16 %v400_v8, %v400_v8  ;;  %v1393_v15 = vpop.f32.mrb[3].mxu0  ;;  %v494_v16 = vpop.f32.mrb[2].mxu1  ;;  %v1008_v13 = vld [vmem:[#allocation3 + $0x18] sm:$0xff] }
  0xf2   : > { %v1401_v17 = vpop.f32.mrb[3].mxu1  ;;  %v561_v18 = vsel %vm431_vm2, %v497_v12, 0 }
  0xf3   : > { %403 = vst.msk [vmem:[#allocation2] sm:$0xf] %vm402_vm3, %v401_v14  ;;  %412 = vrot.lane.b32.xlu1 %v401_v14, %s1647_s18  ;;  %407 = vrot.lane.b32.xlu0 %v401_v14, %s1648_s19 }
  0xf4   : > { %1411 = vmatpush3.bf16.xpose.msra.mxu1 %v561_v18 }
  0xf5   : > { %1422 = vmatprep.subr.bf16.mxu1 %v1645_v1 }
  0xf7   : > { %824 = vrot.lane.b32.xlu1 %v497_v12, %s1647_s18  ;;  %688 = vrot.lane.b32.xlu0 %v497_v12, %s1648_s19  ;;  %v548_v60 = vpop.f32.mrb[4].mxu0 }
  0xf8   : > { %v554_v61 = vpack.c.bf16 %v548_v60, %v548_v60  ;;  %v1408_v62 = vpop.f32.mrb[5].mxu0 }
  0xf9   : > { %v551_v63 = vpop.f32.mrb[6].mxu0 }
  0xfa   : > { %v555_v19 = vld [vmem:[#allocation2] sm:$0xf]  ;;  %v640_v0 = vsel %vm638_vm5, %v554_v61, 0  ;;  %v1409_v2 = vpop.f32.mrb[7].mxu0 }
  0xfb   : > { %959 = vrot.lane.b32.xlu1 %v497_v12, %s1649_s20  ;;  %417 = vrot.lane.b32.xlu0 %v401_v14, %s1649_s20  ;;  %v890_v63 = vld [vmem:[#allocation4 + $0x10] sm:$0xff] }
  0xfc   : > { %1413 = vmatmul.mubr.msk.bf16.vlgmr.msra.gmra.mrb[4].mxu1 %vm431_vm2, %v555_v19  ;;  %1417 = vmatpush3.bf16.msra.mxu0 %v640_v0 }
  0xfd   : > { %1424 = vmatprep.mubr.msk.bf16.mxu1 %vm1646_vm0, %v1645_v1  ;;  %1428 = vmatprep.subr.bf16.mxu0 %v1645_v1 }
 0x165   : > { %v413_v22 = vpop.permute.xlu1 %412  ;;  %v408_v23 = vpop.permute.xlu0 %407 }
 0x166   : > { %416 = vst.msk [vmem:[#allocation2 + $0x8] sm:$0xf] %vm402_vm3, %v413_v22  ;;  %411 = vst.msk [vmem:[#allocation2 + $0x4] sm:$0xf] %vm402_vm3, %v408_v23 }
 0x169   : > { %v689_v24 = vpop.permute.xlu0 %688  ;;  %v825_v27 = vpop.permute.xlu1 %824 }
 0x16a   : > { %v694_v25 = vsel %vm431_vm2, %v689_v24, 0  ;;  %v830_v29 = vsel %vm431_vm2, %v825_v27, 0 }
 0x16b   : > { %1423 = vmatpush3.bf16.xpose.msra.mxu1 %v694_v25 }
 0x16c   : > { %1434 = vmatprep.subr.bf16.mxu1 %v1645_v1 }
 0x16d   : > { %v418_v26 = vpop.permute.xlu0 %417  ;;  %v686_v28 = vld [vmem:[#allocation2 + $0x4] sm:$0xf]  ;;  %v960_v30 = vpop.permute.xlu1 %959  ;;  %v823_v31 = vld [vmem:[#allocation2 + $0x8] sm:$0xf] }
 0x16e   : > { %421 = vst.msk [vmem:[#allocation2 + $0xc] sm:$0xf] %vm402_vm3, %v418_v26  ;;  %v965_v32 = vsel %vm431_vm2, %v960_v30, 0 }
 0x172   : > { %1425 = vmatmul.mubr.msk.bf16.vlgmr.msra.gmra.mrb[8].mxu1 %vm431_vm2, %v686_v28 }
 0x173   : > { %1435 = vmatpush3.bf16.xpose.msra.mxu1 %v830_v29  ;;  %1436 = vmatprep.mubr.msk.bf16.mxu1 %vm1646_vm0, %v1645_v1 }
 0x174   : > { %1446 = vmatprep.subr.bf16.mxu1 %v1645_v1 }
 0x175   : > { %v958_v33 = vld [vmem:[#allocation2 + $0xc] sm:$0xf] }
 0x17a   : > { %1437 = vmatmul.mubr.msk.bf16.vlgmr.msra.gmra.mrb[12].mxu1 %vm431_vm2, %v823_v31 }
 0x17b   : > { %1447 = vmatpush3.bf16.xpose.msra.mxu1 %v965_v32  ;;  %1448 = vmatprep.mubr.msk.bf16.mxu1 %vm1646_vm0, %v1645_v1 }
 0x17c   : > { %1458 = vmatprep.subr.bf16.mxu1 %v1645_v1 }
 0x182   : > { %1449 = vmatmul.mubr.msk.bf16.vlgmr.msra.gmra.mrb[16].mxu1 %vm431_vm2, %v958_v33 }
 0x183   : > { %1462 = vmatprep.mubr.msk.bf16.mxu1 %vm1646_vm0, %v1645_v1 }
 0x1cf   : > { %v1836_v34 = vpop.f32.mrb[4].mxu1 }
 0x1d0   : > { %v1414_v35 = vpop.f32.mrb[5].mxu1  ;;  %v604_v36 = vsel %vm431_vm2, %v1836_v34, -inf }
 0x1d1   : > { %605 = vmax.xlane.f32.xlu0 %v604_v36  ;;  %v600_v37 = vpop.f32.mrb[6].mxu1 }
 0x1d2   : > { %v1415_v38 = vpop.f32.mrb[7].mxu1 }
 0x245   : > { %v1852_v41 = vpop.f32.mrb[8].mxu1 }
 0x246   : > { %v1426_v42 = vpop.f32.mrb[9].mxu1  ;;  %v738_v43 = vsel %vm431_vm2, %v1852_v41, -inf }
 0x247   : > { %739 = vmax.xlane.f32.xlu1 %v738_v43  ;;  %v733_v44 = vpop.f32.mrb[10].mxu1 }
 0x248   : > { %v1427_v45 = vpop.f32.mrb[11].mxu1 }
 0x24d   : > { %v866_v46 = vpop.f32.mrb[12].mxu1 }
 0x24e   : > { %v1438_v47 = vpop.f32.mrb[13].mxu1  ;;  %v874_v48 = vsel %vm431_vm2, %v866_v46, -inf }
 0x24f   : > { %875 = vmax.xlane.f32.xlu0 %v874_v48  ;;  %v869_v49 = vpop.f32.mrb[14].mxu1 }
 0x250   : > { %v1439_v50 = vpop.f32.mrb[15].mxu1 }
 0x255   : > { %v1857_v51 = vpop.f32.mrb[16].mxu1 }
 0x256   : > { %v1450_v52 = vpop.f32.mrb[17].mxu1  ;;  %v1009_v53 = vsel %vm431_vm2, %v1857_v51, -inf }
 0x257   : > { %1010 = vmax.xlane.f32.xlu0 %v1009_v53  ;;  %v1004_v54 = vpop.f32.mrb[18].mxu1 }
 0x258   : > { %v1451_v55 = vpop.f32.mrb[19].mxu1 }
 0x259   : > { %v754_v55 = vld [vmem:[#allocation4 + $0x8] sm:$0xff] }
 0x25e   : > { %v606_v57 = vpop.xlane.xlu0 %605 }
 0x25f   : > { %v1864_v58 = vmax.f32 %v1861_v56, %v606_v57 }
 0x261   : > { %v608_v59 = vsub.f32 %v1861_v56, %v1864_v58  ;;  %684 = vst.msk [vmem:[#allocation3] sm:$0xff] %vm422_vm4, %v1864_v58  ;;  %613 = vperm.xlu1 %1531, %v1864_v58  }
 0x263   : > { %v609_v62 = vmul.f32 1.442695, %v608_v59 }
 0x2d4   : > { %v740_v4 = vpop.xlane.xlu1 %739 }
 0x2d5   : > { %v741_v5 = vmax.f32 %v737_v3, %v740_v4 }
 0x2d7   : > { %v742_v6 = vsub.f32 %v737_v3, %v741_v5  ;;  %821 = vst.msk [vmem:[#allocation3 + $0x8] sm:$0xff] %vm422_vm4, %v741_v5  ;;  %747 = vperm.xlu0 %1532, %v741_v5   ;;  %v1025_v5 = vld [vmem:[#allocation4 + $0x18] sm:$0xff] }
 0x2d9   : > { %v743_v42 = vmul.f32 1.442695, %v742_v6 }
 0x2dc   : > { %v876_v8 = vpop.xlane.xlu0 %875 }
 0x2dd   : > { %v1877_v9 = vmax.f32 %v1874_v7, %v876_v8 }
 0x2df   : > { %v878_v10 = vsub.f32 %v1874_v7, %v1877_v9  ;;  %956 = vst.msk [vmem:[#allocation3 + $0x10] sm:$0xff] %vm422_vm4, %v1877_v9  ;;  %883 = vperm.xlu1 %1531, %v1877_v9   ;;  %v619_v9 = vld [vmem:[#allocation4] sm:$0xff] }
 0x2e0   : > { %v614_v11 = vpop.permute.xlu1 %613 }
 0x2e1   : > { %v616_v12 = vsub.f32 %v1836_v34, %v614_v11  ;;  %v879_v45 = vmul.f32 1.442695, %v878_v10 }
 0x2e3   : > { %v617_v14 = vmul.f32 1.442695, %v616_v12 }
 0x2e4   : > { %v1011_v15 = vpop.xlane.xlu0 %1010 }
 0x2e5   : > { %1541 = vpow2.f32 %v617_v14  ;;  %v1012_v16 = vmax.f32 %v1008_v13, %v1011_v15 }
 0x2e7   : > { %v1013_v17 = vsub.f32 %v1008_v13, %v1012_v16  ;;  %1091 = vst.msk [vmem:[#allocation3 + $0x18] sm:$0xff] %vm422_vm4, %v1012_v16  ;;  %1018 = vperm.xlu1 %1531, %v1012_v16  }
 0x2e9   : > { %v1014_v47 = vmul.f32 1.442695, %v1013_v17 }
 0x2eb   : > { %771 = vrot.lane.b32.xlu1 %v554_v61, %s1648_s19  ;;  %s317_s19 = sand.u32 1, %s1627_s25  }
 0x2ec   : > { %s1220_s27 = scalar_lea.sflag [#allocation7], %s317_s19 }
 0x2ef   : > { %v1542_v18 = vpop.eup %1541  ;;  %906 = vrot.lane.b32.xlu1 %v554_v61, %s1647_s18  ;;  %s1654_s18 = smov 24  }
 0x2f0   : > { %v634_v19 = vpack.c.bf16 %v1542_v18, %v1542_v18  ;;  %v621_v44 = vsel %vm431_vm2, %v1542_v18, 0.0  ;;  %v762_v18 = vld [vmem:[#allocation5 + $0x8] sm:$0xff] }
 0x2f2   : > { %1419 = vmatmul.mubr.msk.bf16.vlgmr.msra.gmra.mrb[8].mxu0 %vm431_vm2, %v634_v19 }
 0x2f3   : > { %1041 = vrot.lane.b32.xlu1 %v554_v61, %s1649_s20  ;;  %1430 = vmatprep.mubr.msk.bf16.mxu0 %vm1646_vm0, %v1645_v1  ;;  %s1328_s20 = sshll.u32 %s317_s19, 3 }
 0x2f4   : > { %s319_s30 = scalar_lea.vmem [#allocation6], %s1328_s20 }
 0x2f5   : > { %s1234_s8 = sshll.u32 %s319_s30, 4  ;;  %s1943_s8 = int_to_ptr.vmem [resolvable:$true] %s1234_s8 }
 0x356   : > { %v748_v20 = vpop.permute.xlu0 %747 }
 0x357   : > { %v750_v21 = vsub.f32 %v1852_v41, %v748_v20 }
 0x359   : > { %v751_v22 = vmul.f32 1.442695, %v750_v21 }
 0x35b   : > { %1543 = vpow2.f32 %v751_v22 }
 0x35e   : > { %v884_v23 = vpop.permute.xlu1 %883 }
 0x35f   : > { %v886_v24 = vsub.f32 %v866_v46, %v884_v23 }
 0x361   : > { %v887_v25 = vmul.f32 1.442695, %v886_v24 }
 0x363   : > { %1545 = vpow2.f32 %v887_v25 }
 0x365   : > { %v1544_v26 = vpop.eup %1543 }
 0x366   : > { %v1019_v27 = vpop.permute.xlu1 %1018  ;;  %v756_v28 = vsel %vm431_vm2, %v1544_v26, 0.0  ;;  %v769_v34 = vpack.c.bf16 %v1544_v26, %v1544_v26  ;;  %v898_v26 = vld [vmem:[#allocation5 + $0x10] sm:$0xff] }
 0x367   : > { %v1021_v29 = vsub.f32 %v1857_v51, %v1019_v27  ;;  %757 = vadd.xlane.f32.xlu1 %v756_v28 }
 0x369   : > { %v1022_v30 = vmul.f32 1.442695, %v1021_v29 }
 0x36a   : > { %v772_v31 = vpop.permute.xlu1 %771 }
 0x36b   : > { %1547 = vpow2.f32 %v1022_v30  ;;  %v777_v32 = vsel %vm638_vm5, %v772_v31, 0 }
 0x36c   : > { %1429 = vmatpush3.bf16.msra.mxu0 %v777_v32  ;;  %1549 = vpow2.f32 %v743_v42 }
 0x36d   : > { %v1546_v33 = vpop.eup %1545  ;;  %1440 = vmatprep.subr.bf16.mxu0 %v1645_v1  ;;  %1551 = vpow2.f32 %v879_v45 }
 0x36e   : > { %v892_v35 = vsel %vm431_vm2, %v1546_v33, 0.0  ;;  %v907_v36 = vpop.permute.xlu1 %906  ;;  %v905_v40 = vpack.c.bf16 %v1546_v33, %v1546_v33  ;;  %1553 = vpow2.f32 %v1014_v47 }
 0x36f   : > { %893 = vadd.xlane.f32.xlu0 %v892_v35  ;;  %1431 = vmatmul.mubr.msk.bf16.vlgmr.msra.gmra.mrb[12].mxu0 %vm431_vm2, %v769_v34  ;;  %v912_v37 = vsel %vm638_vm5, %v907_v36, 0  ;;  %1555 = vpow2.f32 %v609_v62  ;;  %v1033_v34 = vld [vmem:[#allocation5 + $0x18] sm:$0xff] }
 0x370   : > { %1441 = vmatpush3.bf16.msra.mxu0 %v912_v37  ;;  %1442 = vmatprep.mubr.msk.bf16.mxu0 %vm1646_vm0, %v1645_v1 }
 0x371   : > { %1452 = vmatprep.subr.bf16.mxu0 %v1645_v1 }
 0x372   : > { %v1042_v38 = vpop.permute.xlu1 %1041 }
 0x373   : > { %v1047_v41 = vsel %vm638_vm5, %v1042_v38, 0 }
 0x375   : > { %v1548_v39 = vpop.eup %1547 }
 0x376   : > { %v1027_v43 = vsel %vm431_vm2, %v1548_v39, 0.0  ;;  %v1040_v46 = vpack.c.bf16 %v1548_v39, %v1548_v39  ;;  %v1550_v48 = vpop.eup %1549 }
 0x377   : > { %1028 = vadd.xlane.f32.xlu1 %v1027_v43  ;;  %1443 = vmatmul.mubr.msk.bf16.vlgmr.msra.gmra.mrb[16].mxu0 %vm431_vm2, %v905_v40  ;;  %v1552_v49 = vpop.eup %1551  ;;  %v755_v57 = vmul.f32 %v1550_v48, %v754_v55 }
 0x378   : > { %1453 = vmatpush3.bf16.msra.mxu0 %v1047_v41  ;;  %1454 = vmatprep.mubr.msk.bf16.mxu0 %vm1646_vm0, %v1645_v1  ;;  %v1554_v50 = vpop.eup %1553  ;;  %v891_v0 = vmul.f32 %v1552_v49, %v890_v63 }
 0x379   : > { %v1026_v6 = vmul.f32 %v1554_v50, %v1025_v5  ;;  %v1556_v7 = vpop.eup %1555 }
 0x37a   : > { %v620_v56 = vmul.f32 %v1556_v7, %v619_v9  ;;  %v1349_v9 = vld [vmem:[%s1995_s6] ss:$0 sm:$0xff] }
 0x37b   : > { %622 = vadd.xlane.f32.xlu1 %v621_v44  ;;  %v1539_v44 = vld [vmem:[%s1994_s5] sm:$0xff]  }
 0x37c   : > { %1459 = vmatpush3.bf16.msra.mxu1 %v1539_v44 }
 0x37d   : > { %1460 = vmatprep.subr.bf16.mxu1 %v1645_v1 }
 0x37f   : > { %1455 = vmatmul.mubr.msk.bf16.vlgmr.msra.gmra.mrb[20].mxu0 %vm431_vm2, %v1040_v46  ;;  %v1540_v46 = vld [vmem:[%s1994_s5 + $0x8] sm:$0xff]  }
 0x380   : > { %1461 = vmatpush3.bf16.msra.mxu1 %v1540_v46 }
 0x385   : > { %765 = vperm.xlu0 %1532, %v1550_v48  }
 0x38c   : > { %901 = vperm.xlu1 %1531, %v1552_v49  }
 0x390   : > { %1036 = vperm.xlu1 %1531, %v1554_v50  }
 0x3c5   : > { %v1910_v51 = vpop.f32.mrb[8].mxu0 }
 0x3c6   : > { %v1420_v52 = vpop.f32.mrb[9].mxu0 }
 0x3c7   : > { %v679_v53 = vpop.f32.mrb[10].mxu0  ;;  %v627_v52 = vld [vmem:[#allocation5] sm:$0xff] }
 0x3c8   : > { %v1421_v54 = vpop.f32.mrb[11].mxu0 }
 0x3f4   : > { %v758_v60 = vpop.xlane.xlu1 %757 }
 0x3f5   : > { %v759_v61 = vadd.f32 %v758_v60, %v755_v57 }
 0x3f7   : > { %760 = vst.msk [vmem:[#allocation4 + $0x8] sm:$0xff] %vm422_vm4, %v759_v61 }
 0x3fc   : > { %v894_v2 = vpop.xlane.xlu0 %893 }
 0x3fd   : > { %v895_v3 = vadd.f32 %v894_v2, %v891_v0 }
 0x3fe   : > { %v1105_v4 = vld [vmem:[#allocation4 + $0x8] sm:$0xff] }
 0x3ff   : > { %896 = vst.msk [vmem:[#allocation4 + $0x10] sm:$0xff] %vm422_vm4, %v895_v3  ;;  %1557 = vrcp.f32 %v1105_v4 }
 0x404   : > { %v1029_v8 = vpop.xlane.xlu1 %1028  ;;  %v766_v19 = vpop.permute.xlu0 %765 }
 0x405   : > { %v1030_v10 = vadd.f32 %v1029_v8, %v1026_v6  ;;  %v768_v20 = vmul.f32 %v766_v19, %v762_v18 }
 0x406   : > { %v1115_v11 = vld [vmem:[#allocation4 + $0x10] sm:$0xff] }
 0x407   : > { %1031 = vst.msk [vmem:[#allocation4 + $0x18] sm:$0xff] %vm422_vm4, %v1030_v10  ;;  %1559 = vrcp.f32 %v1115_v11 }
 0x408   : > { %v623_v58 = vpop.xlane.xlu1 %622 }
 0x409   : > { %v1558_v59 = vpop.eup %1557  ;;  %v624_v12 = vadd.f32 %v623_v58, %v620_v56 }
 0x40a   : > { %1110 = vperm.xlu0 %1532, %v1558_v59  }
 0x40b   : > { %626 = vst.msk [vmem:[#allocation4] sm:$0xff] %vm422_vm4, %v624_v12 }
 0x40c   : > { %v902_v27 = vpop.permute.xlu1 %901 }
 0x40d   : > { %v904_v28 = vmul.f32 %v902_v27, %v898_v26 }
 0x40e   : > { %v1125_v13 = vld [vmem:[#allocation4 + $0x18] sm:$0xff] }
 0x40f   : > { %1561 = vrcp.f32 %v1125_v13 }
 0x410   : > { %v1037_v35 = vpop.permute.xlu1 %1036 }
 0x411   : > { %v1560_v14 = vpop.eup %1559  ;;  %v1039_v36 = vmul.f32 %v1037_v35, %v1033_v34 }
 0x412   : > { %1120 = vperm.xlu1 %1531, %v1560_v14   ;;  %v1095_v15 = vld [vmem:[#allocation4] sm:$0xff] }
 0x413   : > { %1563 = vrcp.f32 %v1095_v15 }
 0x416   : > { %630 = vperm.xlu1 %1531, %v1556_v7  }
 0x419   : > { %v1562_v16 = vpop.eup %1561 }
 0x41a   : > { %1130 = vperm.xlu0 %1532, %v1562_v16  }
 0x41d   : > { %v1564_v17 = vpop.eup %1563 }
 0x41e   : > { %1100 = vperm.xlu0 %1532, %v1564_v17  }
 0x442   : > { %v813_v21 = vpop.f32.mrb[12].mxu0 }
 0x443   : > { %v819_v22 = vadd.f32 %v813_v21, %v768_v20  ;;  %v1432_v23 = vpop.f32.mrb[13].mxu0 }
 0x444   : > { %v816_v24 = vpop.f32.mrb[14].mxu0 }
 0x445   : > { %820 = vst.msk [vmem:[#allocation5 + $0x8] sm:$0xff] %vm431_vm2, %v819_v22  ;;  %v1433_v25 = vpop.f32.mrb[15].mxu0 }
 0x44a   : > { %v948_v29 = vpop.f32.mrb[16].mxu0 }
 0x44b   : > { %v954_v30 = vadd.f32 %v948_v29, %v904_v28  ;;  %v1444_v31 = vpop.f32.mrb[17].mxu0 }
 0x44c   : > { %v951_v32 = vpop.f32.mrb[18].mxu0  ;;  %v1107_v43 = vld [vmem:[#allocation5 + $0x8] sm:$0xff] }
 0x44d   : > { %955 = vst.msk [vmem:[#allocation5 + $0x10] sm:$0xff] %vm431_vm2, %v954_v30  ;;  %v1445_v33 = vpop.f32.mrb[19].mxu0 }
 0x452   : > { %v1083_v37 = vpop.f32.mrb[20].mxu0 }
 0x453   : > { %v1089_v38 = vadd.f32 %v1083_v37, %v1039_v36  ;;  %v1456_v39 = vpop.f32.mrb[21].mxu0 }
 0x454   : > { %v1086_v40 = vpop.f32.mrb[22].mxu0  ;;  %v1117_v49 = vld [vmem:[#allocation5 + $0x10] sm:$0xff] }
 0x455   : > { %1090 = vst.msk [vmem:[#allocation5 + $0x18] sm:$0xff] %vm431_vm2, %v1089_v38  ;;  %v1457_v41 = vpop.f32.mrb[23].mxu0 }
 0x45c   : > { %v1127_v61 = vld [vmem:[#allocation5 + $0x18] sm:$0xff] }
 0x489   : > { %v1111_v42 = vpop.permute.xlu0 %1110 }
 0x48a   : > { %v1113_v45 = vmul.f32 %v1111_v42, %v1107_v43 }
 0x48c   : > { %v1114_v47 = vpack.c.bf16 %v1113_v45, %v1113_v45 }
 0x48e   : > { %1136 = vrot.lane.b32.xlu1 %v1114_v47, %s1652_s16  ;;  %s1565_s16 = scalar_lea.vmem %s1943_s8, 128 }
 0x48f   : > { %p1566_p12 = scmp.ne.s32.totalorder %s1943_s8, %s1565_s16 }
 0x491   : > { %v1121_v48 = vpop.permute.xlu1 %1120  ;;  %p1567_p13 = pnand %p1566_p12, %p1736_p4 }
 0x492   : > { %v1123_v50 = vmul.f32 %v1121_v48, %v1117_v49 }
 0x493   : > { %p1568_p0 = pneg %p1567_p13 }
 0x494   : > { %v1124_v53 = vpack.c.bf16 %v1123_v50, %v1123_v50 }
 0x495   : > { %v631_v54 = vpop.permute.xlu1 %630 }
 0x496   : > { %v633_v55 = vmul.f32 %v631_v54, %v627_v52  ;;  %1139 = vrot.lane.b32.xlu0 %v1124_v53, %s1653_s17  ;;  %s1655_s17 = smov [#allocation6]  }
 0x498   : > { %v682_v57 = vadd.f32 %v1910_v51, %v633_v55 }
 0x499   : > { %v1131_v60 = vpop.permute.xlu0 %1130 }
 0x49a   : > { %683 = vst.msk [vmem:[#allocation5] sm:$0xff] %vm431_vm2, %v682_v57  ;;  %v1133_v62 = vmul.f32 %v1131_v60, %v1127_v61 }
 0x49c   : > { %v1134_v1 = vpack.c.bf16 %v1133_v62, %v1133_v62 }
 0x49d   : > { %v1101_v0 = vpop.permute.xlu0 %1100 }
 0x49e   : > { %1142 = vrot.lane.b32.xlu1 %v1134_v1, %s1654_s18  ;;  %s1569_s18 = sshll.u32 %s1655_s17, 4  ;;  %s1570_s18 = int_to_ptr.vmem [resolvable:$false] %s1569_s18 }
 0x49f   : > { %s1571_s20 = scalar_lea.vmem %s1570_s18, 256  ;;  %p1572_p1 = scmp.lt.s32.totalorder %s1943_s8, %s1570_s18 }
 0x4a0   : > { %p1573_p2 = scmp.lt.s32.totalorder %s1571_s20, %s1565_s16 }
 0x4a1   : > { %v1097_v63 = vld [vmem:[#allocation5] sm:$0xff] }
 0x4a2   : > { %v1103_v2 = vmul.f32 %v1101_v0, %v1097_v63  ;;  %p1574_p3 = por %p1573_p2, %p1572_p1 }
 0x4a4   : > { %v1104_v4 = vpack.c.bf16 %v1103_v2, %v1103_v2  ;;  %p1575_p5 = pnand %p1574_p3, %p1568_p0 }
 0x500   : > { %v1137_v3 = vpop.permute.xlu1 %1136 }
 0x501   : > { %v1146_v51 = vsel %vm431_vm2, %v1104_v4, %v1137_v3 }
 0x508   : > { %v1140_v5 = vpop.permute.xlu0 %1139 }
 0x509   : > { %v1149_v6 = vsel %vm1147_vm6, %v1146_v51, %v1140_v5 }
 0x510   : > { %v1143_v7 = vpop.permute.xlu1 %1142 }
 0x511   : > { %v1152_v8 = vsel %vm1150_vm7, %v1149_v6, %v1143_v7 }
 0x512   : > { %1463 = vmatmul.mubr.msk.bf16.vlgmr.msra.gmra.mrb[20].mxu1 %vm356_vm1, %v1152_v8 }
 0x5e5   : > { %v1212_v10 = vpop.f32.mrb[20].mxu1 }
 0x5e6   : > { %v1213_v11 = vadd.f32 %v1349_v9, %v1212_v10  ;;  %v1464_v56 = vpop.f32.mrb[21].mxu1 }
 0x5e7   : > { %v1215_v58 = vpop.f32.mrb[22].mxu1 }
 0x5e8   : > { %v1465_v59 = vpop.f32.mrb[23].mxu1  ;;  %1218 = vst.msk [vmem:[%s319_s30] sm:$0xff] %vm356_vm1, %v1213_v11 }
 0x5e9   : > { %1578 = shalt.err (!%p1575_p5)
}
 0x5ea   : > { %s1579_s19 = scalar_lea.hbm %s1941_s15, 128  ;;  %s1583_s23 = scalar_lea.hbm %s1996_s7, 256 }
 0x5eb   : > { %p1580_p6 = scmp.ne.s32.totalorder %s1941_s15, %s1579_s19  ;;  %p1584_p10 = scmp.lt.u32.totalorder %s1941_s15, %s1996_s7 }
 0x5ec   : > { %p1585_p11 = scmp.lt.u32.totalorder %s1583_s23, %s1579_s19  ;;  %p1587_p13 = scmp.lt.u32.totalorder %s1579_s19, %s1941_s15 }
 0x5ed   : > { %p1581_p7 = pnand %p1580_p6, %p1736_p4 }
 0x5ee   : > { %p1586_p12 = por %p1585_p11, %p1584_p10 }
 0x5ef   : > { %p1582_p9 = pneg %p1581_p7 }
 0x5f0   : > { %p1588_p0 = por %p1587_p13, %p1586_p12 }
 0x5f2   : > { %p1589_p1 = pnand %p1588_p0, %p1582_p9 }
 0x5f4   : > { %1592 = shalt.err (!%p1589_p1)
}
 0x5f5   : > { %1466 = dma.vmem_to_hbm [thread:$0]  (%p1736_p4), %s1943_s8, 128, %s1941_s15, %s1220_s27  }
 0x5f6 PF: > { %p1472_p2 = scmp.ge.s32.totalorder %s1643_s29, 2  ;;  %s1246_s12 = sand.u32 1, %s1623_s24  }
 0x5f7   : > { %s1247_s16 = scalar_lea.sflag [#allocation7], %s1246_s12 }
 0x5f8   : > { %p1469_p3 = pnand %p1472_p2, %p1743_p8 }
 0x5fa   : > { %1618 = dma.done.wait (!%p1469_p3), %s1247_s16, 128  }
 0x5fb   : > { %1620 = vsyncadd (!%p1469_p3), %s1247_s16, 4294967168  ;;  %s20_s29 = sadd.s32 1, %s1643_s29   ;;  %s1999_s24 = smov %s1627_s25 }
 0x5fc   : > { %p17_p5 = scmp.ge.s32.totalorder %s20_s29, 4   ;;  %s2000_s25 = smov %s1631_s26 }
 0x5fd   : > { %s2001_s26 = smov %s1749_s14  ;;  %s2002_s27 = smov %s1639_s28 }
 0x5fe   : > { %s2003_s28 = smov %s2005_s9  ;;  %19 = sbr.rel (!%p17_p5) target bundleno = 4 (0x4), region = 109 }
 0x605   :  { %1252 = vsyncpa [#allocation7], 1 }
 0x606   :  { %1254 = vsyncpa [#allocation7 + $0x1], 1 }

</bundles_post_ra>
